<compile_context>
chip_gen: v5e
topology: v5e:2x2
jax: 0.10.0
libtpu: 0.0.40
codegen_flags: <defaults>
</compile_context>

<pallas_src>
import functools

import jax
import jax.numpy as jnp
from jax import lax
from jax.experimental import pallas as pl
from jax.experimental.pallas import tpu as pltpu


# ============================== Pallas kernels ==============================

def _adj_tile_kernel(q_ref, g_ref, adj_ref, *, inv_sigma, bf16_matmul):
    """One (tm, tn) tile of adj = (normalize(q) @ normalize(g).T) / sigma."""
    q = q_ref[...]                                                # [tm, D] f32
    g = g_ref[...]                                                # [tn, D] f32
    # Inverse L2 row norm via one EUP rsqrt per row.
    # clamp(sum_sq, 1e-24) == clamp(norm, 1e-12) from the PyTorch module.
    q_inv = lax.rsqrt(jnp.maximum(jnp.sum(q * q, axis=1, keepdims=True), 1e-24))
    g_inv = lax.rsqrt(jnp.maximum(jnp.sum(g * g, axis=1, keepdims=True), 1e-24))
    if inv_sigma != 1.0:
        # Fold 1/sigma into the per-row scale (O(tm)) instead of an O(tm*tn)
        # multiply over the adjacency tile; skipped entirely at sigma == 1.0.
        q_inv = q_inv * inv_sigma
    q_n = q * q_inv
    g_n = g * g_inv
    if bf16_matmul:
        # MXU-native operands on v6e/v7x; accumulation stays f32 below.
        q_n = q_n.astype(jnp.bfloat16)
        g_n = g_n.astype(jnp.bfloat16)
    # q_n @ g_n.T without materializing a transpose (contract on D).
    w = lax.dot_general(q_n, g_n, (((1,), (1,)), ((), ())),
                        preferred_element_type=jnp.float32)      # [tm, tn] f32
    adj_ref[...] = w.astype(adj_ref.dtype)


def _pair_labels_kernel(tcol_ref, trow_ref, lbl_ref):
    """(targets[:,None] == targets[None,:]).float(), one (tm, tn) tile."""
    lbl_ref[...] = (tcol_ref[...] == trow_ref[...]).astype(lbl_ref.dtype)


# ============================== helpers ==============================

def _pick_tile(n, preferred, quantum):
    """Largest tile <= preferred that divides n and is a multiple of `quantum`;
    falls back to the full dim (block == full array dim is always legal)."""
    if n <= preferred:
        return n
    t = (preferred // quantum) * quantum
    while t >= quantum:
        if n % t == 0:
            return t
        t -= quantum
    return n


def _vmem_limit_bytes(*tile_bytes):
    """Rough double-buffered footprint. Only override the compiler's scoped
    default when the tiles need it; cap at 64 MiB (legal on v7x)."""
    need = 2 * sum(tile_bytes)
    if need <= 16 * 2 ** 20:
        return None
    return int(min(64 * 2 ** 20, need + (4 << 20)))


# ============================== wrappers ==============================

def adj_compute(query_feat, gallery_feat, *, sigma=1.0, bf16_matmul=True,
                out_dtype=jnp.float32, tile_m=None, tile_n=None):
    """Cosine-similarity adjacency: (normalize(q) @ normalize(g).T) / sigma."""
    nq, d = query_feat.shape
    ng, d2 = gallery_feat.shape
    assert d == d2, "query/gallery feature dims must match"

    tm = tile_m if tile_m is not None else _pick_tile(nq, 512, 8)
    tn = tile_n if tile_n is not None else _pick_tile(ng, 512, 128)
    assert nq % tm == 0 and ng % tn == 0, "tiles must divide (Nq, Ng)"
    grid = (nq // tm, ng // tn)

    limit = _vmem_limit_bytes(tm * d * 4, tn * d * 4,
                              tm * tn * jnp.dtype(out_dtype).itemsize)

    return pl.pallas_call(
        functools.partial(_adj_tile_kernel,
                          inv_sigma=1.0 / float(sigma),
                          bf16_matmul=bf16_matmul),
        out_shape=jax.ShapeDtypeStruct((nq, ng), out_dtype),
        grid_spec=pltpu.PrefetchScalarGridSpec(
            num_scalar_prefetch=0,
            grid=grid,
            in_specs=[pl.BlockSpec((tm, d), lambda i, j: (i, 0)),   # q row tile
                      pl.BlockSpec((tn, d), lambda i, j: (j, 0))],  # g row tile
            out_specs=pl.BlockSpec((tm, tn), lambda i, j: (i, j))),
        compiler_params=pltpu.CompilerParams(
            dimension_semantics=("parallel", "parallel"),
            vmem_limit_bytes=limit),
    )(query_feat, gallery_feat)


def pair_labels_compute(targets, nq):
    """[Nq, Nq] float mask of matching labels, tiled independently of adj."""
    assert targets.shape == (nq,), "targets must hold one label per query row"
    t = targets.astype(jnp.int32)
    tm = _pick_tile(nq, 512, 8)
    tn = _pick_tile(nq, 512, 128)
    grid = (nq // tm, nq // tn)
    return pl.pallas_call(
        _pair_labels_kernel,
        out_shape=jax.ShapeDtypeStruct((nq, nq), jnp.float32),
        grid_spec=pltpu.PrefetchScalarGridSpec(
            num_scalar_prefetch=0,
            grid=grid,
            in_specs=[pl.BlockSpec((tm, 1), lambda i, j: (i, 0)),
                      pl.BlockSpec((1, tn), lambda i, j: (0, j))],
            out_specs=pl.BlockSpec((tm, tn), lambda i, j: (i, j))),
        compiler_params=pltpu.CompilerParams(
            dimension_semantics=("parallel", "parallel")),
    )(t.reshape(nq, 1), t.reshape(1, nq))


def inner_product_decoder(query_feat, gallery_feat, targets=None, *,
                          sigma=1.0, bf16_matmul=True, out_dtype=jnp.float32,
                          tile_m=None, tile_n=None):
    """Mirrors InnerProductDecoder.forward -> (adj, pair_labels)."""
    adj = adj_compute(query_feat, gallery_feat, sigma=sigma,
                      bf16_matmul=bf16_matmul, out_dtype=out_dtype,
                      tile_m=tile_m, tile_n=tile_n)
    if targets is None:
        return adj, None
    pair_labels = pair_labels_compute(targets, query_feat.shape[0])
    return adj, pair_labels


# ============================== main ==============================

if __name__ == "__main__":
    key = jax.random.PRNGKey(0)
    kq, kg, kt = jax.random.split(key, 3)

    # Small shapes consistent with the module: [N, D] query/gallery embeddings.
    NQ, NG, D = 256, 384, 256
    SIGMA = 2.0   # exercises the folded 1/sigma path

    q = jax.random.normal(kq, (NQ, D), jnp.float32)
    g = jax.random.normal(kg, (NG, D), jnp.float32)
    targets = jax.random.randint(kt, (NQ,), 0, 16, jnp.int32)

    # Default fast path: bf16 MXU operands, explicit 128-tiles -> grid (2, 3),
    # plus the fused pair-label kernel (targets given).
    adj_bf16, lbl = inner_product_decoder(q, g, targets, sigma=SIGMA,
                                          tile_m=128, tile_n=128)
    adj_bf16, lbl = jax.block_until_ready((adj_bf16, lbl))

    # Validation path: f32 MXU operands, default tile selection (grid (1, 1)).
    adj_f32, lbl_none = inner_product_decoder(q, g, None, sigma=SIGMA,
                                              bf16_matmul=False)
    adj_f32 = jax.block_until_ready(adj_f32)

    # pure-JAX reference (matches the PyTorch math)
    def ref_adj(qf, gf, sig):
        qn = qf / jnp.maximum(jnp.linalg.norm(qf, axis=1, keepdims=True), 1e-12)
        gn = gf / jnp.maximum(jnp.linalg.norm(gf, axis=1, keepdims=True), 1e-12)
        return jnp.matmul(qn, gn.T, precision=lax.Precision.HIGHEST) / sig

    adj_ref = ref_adj(q, g, SIGMA)
    lbl_ref = (targets[:, None] == targets[None, :]).astype(jnp.float32)

    assert adj_bf16.shape == (NQ, NG) and adj_f32.shape == (NQ, NG)
    assert lbl_none is None and lbl.shape == (NQ, NQ)
    assert bool(jnp.all(jnp.isfinite(adj_bf16)))
    assert bool(jnp.allclose(adj_f32, adj_ref, atol=2e-3, rtol=2e-3))
    assert bool(jnp.allclose(adj_bf16, adj_ref, atol=2e-2, rtol=2e-2))
    assert bool(jnp.array_equal(lbl, lbl_ref))
    print("KERNEL_OK")
</pallas_src>

<mosaic_0001>
module attributes {stable_mosaic.version = 11 : i64} {
  func.func @_adj_tile_kernel(%arg0: i32, %arg1: i32, %arg2: memref<128x256xf32, #tpu.memory_space<vmem>>, %arg3: memref<128x256xf32, #tpu.memory_space<vmem>>, %arg4: memref<128x128xf32, #tpu.memory_space<vmem>>) attributes {dimension_semantics = [#tpu.dimension_semantics<parallel>, #tpu.dimension_semantics<parallel>], iteration_bounds = array<i64: 2, 3>, scalar_prefetch = 0 : i64, scratch_operands = 0 : i64, tpu.core_type = #tpu.core_type<tc>, window_params = [{transform_indices = @transform_0, window_bounds = array<i64: 128, 256>}, {transform_indices = @transform_1, window_bounds = array<i64: 128, 256>}, {transform_indices = @transform_2, window_bounds = array<i64: 128, 128>}]} {
    %c0 = arith.constant 0 : index
    %c0_0 = arith.constant 0 : index
    %0 = vector.load %arg2[%c0, %c0_0] : memref<128x256xf32, #tpu.memory_space<vmem>>, vector<128x256xf32>
    %c0_1 = arith.constant 0 : index
    %c0_2 = arith.constant 0 : index
    %1 = vector.load %arg3[%c0_1, %c0_2] : memref<128x256xf32, #tpu.memory_space<vmem>>, vector<128x256xf32>
    %2 = arith.mulf %0, %0 : vector<128x256xf32>
    %cst = arith.constant dense<0.000000e+00> : vector<128xf32>
    %3 = vector.multi_reduction <add>, %2, %cst [1] : vector<128x256xf32> to vector<128xf32>
    %4 = vector.shape_cast %3 : vector<128xf32> to vector<128x1xf32>
    %cst_3 = arith.constant 1.000000e-24 : f32
    %5 = vector.broadcast %cst_3 : f32 to vector<128x1xf32>
    %6 = arith.maximumf %4, %5 : vector<128x1xf32>
    %7 = math.rsqrt %6 : vector<128x1xf32>
    %8 = arith.mulf %1, %1 : vector<128x256xf32>
    %cst_4 = arith.constant dense<0.000000e+00> : vector<128xf32>
    %9 = vector.multi_reduction <add>, %8, %cst_4 [1] : vector<128x256xf32> to vector<128xf32>
    %10 = vector.shape_cast %9 : vector<128xf32> to vector<128x1xf32>
    %cst_5 = arith.constant 1.000000e-24 : f32
    %11 = vector.broadcast %cst_5 : f32 to vector<128x1xf32>
    %12 = arith.maximumf %10, %11 : vector<128x1xf32>
    %13 = math.rsqrt %12 : vector<128x1xf32>
    %cst_6 = arith.constant 5.000000e-01 : f32
    %14 = vector.broadcast %cst_6 : f32 to vector<128x1xf32>
    %15 = arith.mulf %7, %14 : vector<128x1xf32>
    %16 = vector.broadcast %15 : vector<128x1xf32> to vector<128x256xf32>
    %17 = arith.mulf %0, %16 : vector<128x256xf32>
    %18 = vector.broadcast %13 : vector<128x1xf32> to vector<128x256xf32>
    %19 = arith.mulf %1, %18 : vector<128x256xf32>
    %20 = arith.truncf %17 : vector<128x256xf32> to vector<128x256xbf16>
    %21 = arith.truncf %19 : vector<128x256xf32> to vector<128x256xbf16>
    %cst_7 = arith.constant dense<0.000000e+00> : vector<128x128xf32>
    %22 = tpu.matmul %20, %21, %cst_7 {dimension_numbers = #tpu.dot_dimension_numbers<[1], [1], [0], [0], [0, 0, 1, 0], [], []>} : vector<128x256xbf16>, vector<128x256xbf16>, vector<128x128xf32> -> vector<128x128xf32>
    %c0_8 = arith.constant 0 : index
    %c0_9 = arith.constant 0 : index
    %23 = vector.load %arg4[%c0_8, %c0_9] : memref<128x128xf32, #tpu.memory_space<vmem>>, vector<128x128xf32>
    tpu.vector_store %arg4[%c0_8, %c0_9], %22 {strides = array<i32>} : memref<128x128xf32, #tpu.memory_space<vmem>>, vector<128x128xf32>,
    return
  }
  func.func @transform_0(%arg0: i32, %arg1: i32) -> (i32, i32) {
    %c0_i32 = arith.constant 0 : i32
    %c0_i32_0 = arith.constant 0 : i32
    return %arg0, %c0_i32 : i32, i32
  }
  func.func @transform_1(%arg0: i32, %arg1: i32) -> (i32, i32) {
    %c0_i32 = arith.constant 0 : i32
    %c0_i32_0 = arith.constant 0 : i32
    return %arg1, %c0_i32 : i32, i32
  }
  func.func @transform_2(%arg0: i32, %arg1: i32) -> (i32, i32) {
    %c0_i32 = arith.constant 0 : i32
    return %arg0, %arg1 : i32, i32
  }
}

</mosaic_0001>

<bundles_post_ra>
// kernel: tpu_custom_call.1
= control target key start
LH: loop header
LB: loop body
LE: loop exit
PB: predicated region body
PF: predicated region fallthrough
CT: control target
= control target key end

     0   :  { %s2846_s0 = inlined_call_operand.hbm [shape: f32[256,256], index: 0, kind: input, shape index: {}]   ;;  %s2847_s1 = inlined_call_operand.hbm [shape: f32[384,256], index: 1, kind: input, shape index: {}]   ;;  %s2848_s2 = inlined_call_operand.hbm [shape: f32[256,384], index: 2, kind: output, shape index: {}]  }
   0x1   :  { %2866 = sst [smem:[#allocation26_spill]] %s2846_s0 }
   0x2   :  { %2867 = sst [smem:[#allocation27_spill]] %s2848_s2 }
   0x3   :  { %7 = vsyncpa [#allocation3], 0 }
   0x4   :  { %9 = vsyncpa [#allocation3 + $0x1], 0 }
   0x5   :  { %10 = vsyncpa [#allocation6], 0 }
   0x6   :  { %12 = vsyncpa [#allocation6 + $0x1], 0 }
   0x7   :  { %13 = vsyncpa [#allocation4], 0 }
   0x8   :  { %15 = vsyncpa [#allocation4 + $0x1], 0  ;;  %s1653_s9 = smov 0   ;;  %s1655_s10 = smov 0  }
   0x9   :  { %s1657_s11 = smov 0   ;;  %s1659_s12 = smov 0  }
   0xa   :  { %s1661_s13 = smov 0   ;;  %s1663_s14 = smov 0  }
   0xb   :  { %s1665_s15 = smov 0   ;;  %s1667_s16 = smov 0  }
   0xc   :  { %s1669_s17 = smov 0   ;;  %s1671_s18 = smov 0  }
   0xd   :  { %s1673_s19 = smov 0   ;;  %s1675_s20 = smov 0  }
   0xe   :  { %s1677_s21 = smov 0   ;;  %s1679_s22 = smov 0  }
   0xf LB: > { %2868 = sst [smem:[#allocation11_spill]] %s1615_s18  ;;  %s1154_s23 = sadd.s32 4294967295, %s1631_s22   ;;  %s1631_s22 = sphi %s1679_s22, %s21_s22   ;;  %s1627_s21 = sphi %s1677_s21, %s2963_s21   ;;  %s1623_s20 = sphi %s1675_s20, %s2975_s20   ;;  %s1619_s19 = sphi %s1673_s19, %s2974_s19   ;;  %s1615_s18 = sphi %s1671_s18, %s2973_s18   ;;  %s1611_s17 = sphi %s1669_s17, %s2972_s17   ;;  %s1607_s16 = sphi %s1667_s16, %s2971_s16   ;;  %s1603_s15 = sphi %s1665_s15, %s2970_s15   ;;  %s1599_s14 = sphi %s1663_s14, %s2969_s14   ;;  %s1595_s13 = sphi %s1661_s13, %s2968_s13   ;;  %s1591_s12 = sphi %s1659_s12, %s2967_s12   ;;  %s1587_s11 = sphi %s1657_s11, %s2966_s11   ;;  %s1583_s10 = sphi %s1655_s10, %s2965_s10   ;;  %s1579_s9 = sphi %s1653_s9, %s2964_s9  }
  0x10   : > { %2869 = sst [smem:[#allocation12_spill]] %s1627_s21  ;;  %s33_s24 = sadd.s32 1, %s1627_s21 }
  0x11   : > { %s40_s25 = sadd.s32 1, %s1611_s17  ;;  %p47_p0 = scmp.ne.s32.totalorder %s1611_s17, %s1607_s16 }
  0x12   : > { %p48_p1 = scmp.eq.s32.totalorder %s1631_s22, 0  ;;  %p53_p2 = scmp.ne.s32.totalorder %s1607_s16, %s1603_s15 }
  0x13   : > { %p1728_p3 = scmp.eq.s32.totalorder %s1154_s23, 0  ;;  %p1732_p4 = scmp.eq.s32.totalorder %s1154_s23, 5 }
  0x14   : > { %p49_p5 = por %p48_p1, %p47_p0  ;;  %p1214_p7 = scmp.lt.s32.totalorder %s1631_s22, 6 }
  0x15   : > { %p1740_p6 = por %p1728_p3, %p53_p2  ;;  %s131_s29 = sand.u32 1, %s1611_s17  }
  0x16   : > { %s1177_s30 = sshll.u32 %s1627_s21, 8  ;;  %s1158_s3 = sshll.u32 %s131_s29, 8 }
  0x17   : > { %s2873_s0 = sld [smem:[#allocation26_spill]]  ;;  %s135_s8 = scalar_lea.vmem [#allocation2], %s1158_s3 }
  0x18   : > { %s144_s15 = sshll.u32 %s135_s8, 4  ;;  %p1204_p8 = pnand %p1214_p7, %p49_p5  ;;  %s145_s15 = int_to_ptr.vmem [resolvable:$true] %s144_s15 }
  0x19   : > { %p1166_p9 = scmp.ge.s32.totalorder %s1631_s22, 1  ;;  %p175_p10 = scmp.lt.s32.totalorder %s1631_s22, 7 }
  0x1a   : > { %s132_s23 = scalar_lea.sflag [#allocation3], %s131_s29  ;;  %s2850_s4 = smov 16  }
  0x1b   : > { %p1757_p11 = pnand %p1166_p9, %p175_p10  ;;  %s1155_s5 = sadd.s32 4294967294, %s1631_s22  }
  0x1c   : > { %s66_s8 = sadd.s32 1, %s1599_s14  ;;  %p73_p13 = scmp.ne.s32.totalorder %s1599_s14, %s1595_s13 }
  0x1d   : > { %s141_s6 = scalar_lea.hbm %s2873_s0, %s1177_s30  ;;  %s2849_s30 = smov 256  }
  0x1e   : > { %s142_s7 = sshll.u32 %s141_s6, 4  ;;  %s30_s6 = sadd.s32 1, %s1623_s20  ;;  %s143_s7 = int_to_ptr.hbm [resolvable:$true] %s142_s7 }
  0x1f   : > { %1206 = dma.hbm_to_vmem [thread:$0]  (!%p1204_p8), %s143_s7, 4096, %s145_s15, %s132_s23, %s2849_s30, %s2849_s30, %s2850_s4  }
  0x20   : > { %p31_p12 = scmp.ge.s32.totalorder %s30_s6, 3  ;;  %p79_p0 = scmp.ne.s32.totalorder %s1595_s13, %s1591_s12 }
  0x21   : > { %s94_s29 = sadd.s32 1, %s1587_s11  ;;  %p1778_p2 = por %p73_p13, %p48_p1 }
  0x22   : > { %s2977_s6 = smov (%p31_p12, %s30_s6), 0  ;;  %s2979_s24 = smov (!%p31_p12, %s33_s24), %s1627_s21 }
  0x23   : > { %2875 = sst [smem:[#allocation13_spill]] %s2977_s6  ;;  %s63_s7 = ssub.s32 %s1623_s20, %s2977_s6 }
  0x24   : > { %p35_p5 = scmp.ge.s32.totalorder %s2979_s24, 2  ;;  %p64_p8 = scmp.eq.s32.totalorder %s63_s7, 0 }
  0x25   : > { %p1784_p9 = por %p79_p0, %p1728_p3  ;;  %p104_p10 = scmp.ne.s32.totalorder %s1587_s11, %s1583_s10 }
  0x26   : > { %s2981_s24 = smov (%p35_p5, %s2979_s24), 0  ;;  %p110_p13 = scmp.ne.s32.totalorder %s1583_s10, %s1579_s9 }
  0x27   : > { %2878 = sst [smem:[#allocation14_spill]] %s2981_s24  ;;  %s37_s30 = ssub.s32 %s1627_s21, %s2981_s24 }
  0x28   : > { %s1793_s23 = scalar_select %p64_p8, %s1599_s14, %s66_s8  }
  0x29   : > { %p1799_p1 = por %p1732_p4, %p104_p10  ;;  %p38_p12 = scmp.eq.s32.totalorder %s37_s30, 0 }
  0x2a   : > { %2879 = sst [smem:[#allocation15_spill]] %s1793_s23  ;;  %s91_s26 = sor.u32 %s63_s7, %s37_s30 }
  0x2b   : > { %s2880_s4 = scalar_select %p1799_p1, 1, 0 }
  0x2c   : > { %p92_p3 = scmp.eq.s32.totalorder %s91_s26, 0  ;;  %p111_p0 = scmp.eq.s32.totalorder %s1155_s5, 5 }
  0x2d   : > { %2881 = sst [smem:[#allocation16_spill]] %s2880_s4  ;;  %s154_s8 = sand.u32 1, %s1599_s14  }
  0x2e   : > { %s1808_s0 = scalar_select %p38_p12, %s1611_s17, %s40_s25  }
  0x2f   : > { %s1811_s6 = scalar_select %p92_p3, %s1587_s11, %s94_s29  }
  0x30   : > { %s1162_s23 = sshll.u32 %s154_s8, 8  ;;  %p1814_p5 = por %p111_p0, %p110_p13 }
  0x31   : > { %s1179_s24 = sshll.u32 %s1623_s20, 8  ;;  %s158_s21 = scalar_lea.vmem [#allocation5], %s1162_s23 }
  0x32   : > { %s167_s4 = sshll.u32 %s158_s21, 4  ;;  %s164_s30 = scalar_lea.hbm %s2847_s1, %s1179_s24  ;;  %s168_s4 = int_to_ptr.vmem [resolvable:$true] %s167_s4 }
  0x33   : > { %s165_s7 = sshll.u32 %s164_s30, 4  ;;  %p1207_p4 = pnand %p1214_p7, %p1778_p2  ;;  %s166_s7 = int_to_ptr.hbm [resolvable:$true] %s165_s7 }
  0x34   : > { %s155_s25 = scalar_lea.sflag [#allocation6], %s154_s8  ;;  %s2883_s5 = smov 16  }
  0x35   : > { %s2884_s29 = smov 256   ;;  %179 = sbr.rel (%p1757_p11) target bundleno = 478 (0x1de), region = 28 }
  0x36   : > { %1209 = dma.hbm_to_vmem [thread:$0]  (!%p1207_p4), %s166_s7, 4096, %s168_s4, %s155_s25, %s2884_s29, %s2884_s29, %s2883_s5  }
  0x3a   : > { %s181_s21 = sand.u32 1, %s1607_s16  }
  0x3b   : > { %s1167_s23 = sshll.u32 %s181_s21, 8  ;;  %s182_s2 = scalar_lea.sflag [#allocation3], %s181_s21 }
  0x3c   : > { %s1832_s18 = scalar_lea.vmem [#allocation2], %s1167_s23 }
  0x3d   : > { %1566 = dma.done.wait (%p1740_p6), %s182_s2, 4096  }
  0x3e   : > { %1568 = vsyncadd (%p1740_p6), %s182_s2, 4294963200  ;;  %s191_s24 = sand.u32 1, %s1595_s13  }
  0x3f   : > { %s1168_s15 = sshll.u32 %s191_s24, 8  ;;  %s192_s4 = scalar_lea.sflag [#allocation6], %s191_s24 }
  0x40   : > { %s1839_s26 = scalar_lea.vmem [#allocation5], %s1168_s15 }
  0x41   : > { %1570 = dma.done.wait (%p1784_p9), %s192_s4, 4096  }
  0x42   : > { %1572 = vsyncadd (%p1784_p9), %s192_s4, 4294963200  ;;  %v1846_v0 = vld [vmem:[%s1839_s26 + $0xe0] sm:$0xff]  ;;  %v1849_v1 = vld [vmem:[%s1839_s26 + $0xe8] sm:$0xff]  ;;  %s219_s28 = sand.u32 1, %s1583_s10   ;;  %s2955_s8 = sld [smem:[#allocation11_spill]] }
  0x43   : > { %v1852_v2 = vld [vmem:[%s1839_s26 + $0xc0] sm:$0xff]  ;;  %v573_v3 = vmul.f32 %v1846_v0, %v1846_v0  ;;  %v574_v4 = vmul.f32 %v1849_v1, %v1849_v1  ;;  %v1859_v5 = vld [vmem:[%s1839_s26 + $0xc8] sm:$0xff]  ;;  %v1876_v12 = vld [vmem:[%s1839_s26 + $0xf0] sm:$0xff]  ;;  %s1169_s3 = sshll.u32 %s219_s28, 7  ;;  %s1196_s30 = smul.u32 48, %s1619_s19 }
  0x44   : > { %v569_v6 = vmul.f32 %v1852_v2, %v1852_v2  ;;  %v1864_v7 = vld [vmem:[%s1839_s26 + $0xa0] sm:$0xff]  ;;  %v1867_v8 = vld [vmem:[%s1839_s26 + $0xa8] sm:$0xff]  ;;  %v570_v9 = vmul.f32 %v1859_v5, %v1859_v5  ;;  %v1879_v13 = vld [vmem:[%s1839_s26 + $0xf8] sm:$0xff]  ;;  %v575_v21 = vmul.f32 %v1876_v12, %v1876_v12  ;;  %s2758_s12 = scalar_lea.vmem [#allocation7], %s1169_s3  ;;  %s2956_s21 = sld [smem:[#allocation27_spill]] }
  0x45   : > { %v565_v10 = vmul.f32 %v1864_v7, %v1864_v7  ;;  %v566_v11 = vmul.f32 %v1867_v8, %v1867_v8  ;;  %v1882_v14 = vld [vmem:[%s1839_s26 + $0xd0] sm:$0xff]  ;;  %v619_v15 = vadd.f32 %v574_v4, %v573_v3  ;;  %v1885_v16 = vld [vmem:[%s1839_s26 + $0xd8] sm:$0xff]  ;;  %v576_v22 = vmul.f32 %v1879_v13, %v1879_v13  ;;  %v1909_v31 = vld [vmem:[%s1839_s26 + $0x80] sm:$0xff]  ;;  %s1028_s15 = scalar_lea.sflag [#allocation4], %s219_s28 }
  0x46   : > { %v1888_v17 = vld [vmem:[%s1839_s26 + $0xb0] sm:$0xff]  ;;  %v1891_v18 = vld [vmem:[%s1839_s26 + $0xb8] sm:$0xff]  ;;  %v613_v19 = vadd.f32 %v570_v9, %v569_v6  ;;  %v571_v23 = vmul.f32 %v1882_v14, %v1882_v14  ;;  %v572_v24 = vmul.f32 %v1885_v16, %v1885_v16  ;;  %v1912_v32 = vld [vmem:[%s1839_s26 + $0x88] sm:$0xff]  ;;  %v561_v37 = vmul.f32 %v1909_v31, %v1909_v31 }
  0x47   : > { %v607_v20 = vadd.f32 %v566_v11, %v565_v10  ;;  %620 = vadd.xlane.f32.xlu0 %v619_v15  ;;  %v567_v25 = vmul.f32 %v1888_v17, %v1888_v17  ;;  %v568_v26 = vmul.f32 %v1891_v18, %v1891_v18  ;;  %v622_v27 = vadd.f32 %v576_v22, %v575_v21  ;;  %v1906_v30 = vld [vmem:[%s1839_s26 + $0x90] sm:$0xff]  ;;  %v1915_v33 = vld [vmem:[%s1839_s26 + $0x98] sm:$0xff]  ;;  %v1918_v34 = vld [vmem:[%s1839_s26 + $0x60] sm:$0xff] }
  0x48   : > { %614 = vadd.xlane.f32.xlu1 %v613_v19  ;;  %v616_v28 = vadd.f32 %v572_v24, %v571_v23  ;;  %v1921_v35 = vld [vmem:[%s1839_s26 + $0x68] sm:$0xff]  ;;  %v563_v36 = vmul.f32 %v1906_v30, %v1906_v30  ;;  %v562_v38 = vmul.f32 %v1912_v32, %v1912_v32  ;;  %v564_v39 = vmul.f32 %v1915_v33, %v1915_v33  ;;  %v1936_v44 = vld [vmem:[%s1839_s26 + $0x70] sm:$0xff]  ;;  %v1939_v45 = vld [vmem:[%s1839_s26 + $0x78] sm:$0xff]  ;;  %s1039_s7 = sadd.s32 %s2955_s8, %s1196_s30 }
  0x49   : > { %608 = vadd.xlane.f32.xlu2 %v607_v20  ;;  %v610_v29 = vadd.f32 %v568_v26, %v567_v25  ;;  %v557_v40 = vmul.f32 %v1918_v34, %v1918_v34  ;;  %v558_v41 = vmul.f32 %v1921_v35, %v1921_v35  ;;  %v1942_v47 = vld [vmem:[%s1839_s26 + $0x50] sm:$0xff]  ;;  %v1945_v48 = vld [vmem:[%s1839_s26 + $0x58] sm:$0xff]  ;;  %v1948_v49 = vld [vmem:[%s1839_s26 + $0x40] sm:$0xff]  ;;  %v559_v51 = vmul.f32 %v1936_v44, %v1936_v44  ;;  %s1173_s25 = sshll.u32 %s1039_s7, 3 }
  0x4a   : > { %v601_v42 = vadd.f32 %v562_v38, %v561_v37  ;;  %v604_v43 = vadd.f32 %v564_v39, %v563_v36  ;;  %v1951_v50 = vld [vmem:[%s1839_s26 + $0x48] sm:$0xff]  ;;  %v560_v52 = vmul.f32 %v1939_v45, %v1939_v45  ;;  %v555_v53 = vmul.f32 %v1942_v47, %v1942_v47  ;;  %v1966_v60 = vld [vmem:[%s1839_s26 + $0x20] sm:$0xff]  ;;  %v1972_v62 = vld [vmem:[%s1839_s26 + $0x30] sm:$0xff]  ;;  %s2957_s23 = smov %s2956_s21  ;;  %s1041_s2 = scalar_lea.hbm %s2956_s21, %s1173_s25 }
  0x4b   : > { %v595_v46 = vadd.f32 %v558_v41, %v557_v40  ;;  %v556_v54 = vmul.f32 %v1945_v48, %v1945_v48  ;;  %v553_v55 = vmul.f32 %v1948_v49, %v1948_v49  ;;  %v554_v56 = vmul.f32 %v1951_v50, %v1951_v50  ;;  %v1969_v61 = vld [vmem:[%s1839_s26 + $0x28] sm:$0xff]  ;;  %v1975_v63 = vld [vmem:[%s1839_s26 + $0x38] sm:$0xff]  ;;  %v1978_v3 = vld [vmem:[%s1839_s26] sm:$0xff]  ;;  %s1044_s24 = sshll.u32 %s1041_s2, 4  ;;  %s1501_s30 = scalar_lea.hbm %s2957_s23, 768  ;;  %s1045_s24 = int_to_ptr.hbm [resolvable:$true] %s1044_s24 }
  0x4c   : > { %v598_v57 = vadd.f32 %v560_v52, %v559_v51  ;;  %v1981_v4 = vld [vmem:[%s1839_s26 + $0x8] sm:$0xff]  ;;  %v549_v6 = vmul.f32 %v1966_v60, %v1966_v60  ;;  %v550_v9 = vmul.f32 %v1969_v61, %v1969_v61  ;;  %v551_v10 = vmul.f32 %v1972_v62, %v1972_v62  ;;  %v1996_v23 = vld [vmem:[%s1839_s26 + $0x10] sm:$0xff]  ;;  %v1999_v24 = vld [vmem:[%s1839_s26 + $0x18] sm:$0xff]  ;;  %s1495_s4 = sshra.s32 %s1045_s24, 4  ;;  %s1496_s4 = int_to_ptr.hbm [resolvable:$true] %s1495_s4 }
  0x4d   : > { %v592_v58 = vadd.f32 %v556_v54, %v555_v53  ;;  %v589_v59 = vadd.f32 %v554_v56, %v553_v55  ;;  %v552_v11 = vmul.f32 %v1975_v63, %v1975_v63  ;;  %v545_v15 = vmul.f32 %v1978_v3, %v1978_v3  ;;  %2885 = vst [vmem:[#allocation17_spill] sm:$0xff] %v1999_v24  ;;  %v2002_v25 = vld [vmem:[%s1832_s18 + $0x90] sm:$0xff]  ;;  %v2005_v26 = vld [vmem:[%s1832_s18 + $0x98] sm:$0xff]  ;;  %v2029_v51 = vld [vmem:[%s1832_s18] sm:$0xff]  ;;  %s1497_s26 = scalar_lea.hbm %s1496_s4, 128  ;;  %p1502_p2 = scmp.lt.s32.totalorder %s1496_s4, %s2957_s23 }
  0x4e   : > { %v546_v19 = vmul.f32 %v1981_v4, %v1981_v4  ;;  %v583_v20 = vadd.f32 %v550_v9, %v549_v6  ;;  %2886 = vst [vmem:[#allocation18_spill] sm:$0xff] %v2002_v25  ;;  %v548_v36 = vmul.f32 %v1999_v24, %v1999_v24  ;;  %v307_v37 = vmul.f32 %v2002_v25, %v2002_v25  ;;  %v2032_v52 = vld [vmem:[%s1832_s18 + $0x8] sm:$0xff]  ;;  %v2035_v53 = vld [vmem:[%s1832_s18 + $0x18] sm:$0xff]  ;;  %v245_v54 = vld [vmem:[%s1832_s18 + $0xa0] sm:$0xff]  ;;  %p1498_p6 = scmp.ne.s32.totalorder %s1496_s4, %s1497_s26  ;;  %p1503_p8 = scmp.lt.s32.totalorder %s1501_s30, %s1497_s26 }
  0x4f   : > { %623 = vadd.xlane.f32.xlu0 %v622_v27  ;;  %v586_v21 = vadd.f32 %v552_v11, %v551_v10  ;;  %2887 = vst [vmem:[#allocation19_spill] sm:$0xff] %v2005_v26  ;;  %v2008_v27 = vld [vmem:[%s1832_s18 + $0x80] sm:$0xff]  ;;  %v308_v38 = vmul.f32 %v2005_v26, %v2005_v26  ;;  %v246_v55 = vld [vmem:[%s1832_s18 + $0xa8] sm:$0xff]  ;;  %v309_v6 = vmul.f32 %v245_v54, %v245_v54 }
  0x50   : > { %617 = vadd.xlane.f32.xlu1 %v616_v28  ;;  %v577_v22 = vadd.f32 %v546_v19, %v545_v15  ;;  %2888 = vst [vmem:[#allocation20_spill] sm:$0xff] %v2008_v27  ;;  %v2011_v28 = vld [vmem:[%s1832_s18 + $0x88] sm:$0xff]  ;;  %v305_v39 = vmul.f32 %v2008_v27, %v2008_v27  ;;  %v310_v9 = vmul.f32 %v246_v55, %v246_v55  ;;  %v247_v19 = vld [vmem:[%s1832_s18 + $0xb0] sm:$0xff]  ;;  %p1499_p7 = pnand %p1498_p6, %p1799_p1  ;;  %p1504_p9 = por %p1503_p8, %p1502_p2 }
  0x51   : > { %611 = vadd.xlane.f32.xlu2 %v610_v29  ;;  %2889 = vst [vmem:[#allocation21_spill] sm:$0xff] %v2011_v28  ;;  %v547_v29 = vmul.f32 %v1996_v23, %v1996_v23  ;;  %v306_v40 = vmul.f32 %v2011_v28, %v2011_v28 }
  0x52   : > { %2891 = vst [vmem:[#allocation23_spill] sm:$0xff] %v2029_v51  ;;  %v351_v15 = vadd.f32 %v310_v9, %v309_v6  ;;  %v233_v6 = vld [vmem:[%s1832_s18 + $0x40] sm:$0xff]  ;;  %v234_v9 = vld [vmem:[%s1832_s18 + $0x48] sm:$0xff]  ;;  %p1500_p11 = pneg %p1499_p7 }
  0x53   : > { %v580_v41 = vadd.f32 %v548_v36, %v547_v29  ;;  %2892 = vst [vmem:[#allocation24_spill] sm:$0xff] %v2032_v52  ;;  %v229_v29 = vld [vmem:[%s1832_s18 + $0x20] sm:$0xff]  ;;  %v230_v36 = vld [vmem:[%s1832_s18 + $0x28] sm:$0xff] }
  0x54   : > { %2893 = vst [vmem:[#allocation25_spill] sm:$0xff] %v2035_v53  ;;  %p1505_p10 = pnand %p1504_p9, %p1500_p11 }
  0x57   : > { %602 = vadd.xlane.f32.xlu0 %v601_v42  ;;  %v348_v42 = vadd.f32 %v308_v38, %v307_v37  ;;  %v311_v37 = vmul.f32 %v247_v19, %v247_v19 }
  0x58   : > { %605 = vadd.xlane.f32.xlu1 %v604_v43  ;;  %v345_v43 = vadd.f32 %v306_v40, %v305_v39 }
  0x59   : > { %596 = vadd.xlane.f32.xlu2 %v595_v46  ;;  %v2026_v46 = vld [vmem:[%s1832_s18 + $0x10] sm:$0xff] }
  0x5a   : > { %2890 = vst [vmem:[#allocation22_spill] sm:$0xff] %v2026_v46  ;;  %v291_v56 = vmul.f32 %v2026_v46, %v2026_v46 }
  0x5f   : > { %599 = vadd.xlane.f32.xlu0 %v598_v57  ;;  %v289_v57 = vmul.f32 %v2029_v51, %v2029_v51 }
  0x60   : > { %590 = vadd.xlane.f32.xlu1 %v589_v59  ;;  %v292_v59 = vmul.f32 %v2035_v53, %v2035_v53 }
  0x61   : > { %593 = vadd.xlane.f32.xlu2 %v592_v58  ;;  %v290_v58 = vmul.f32 %v2032_v52, %v2032_v52 }
  0x62   : > { %v324_v11 = vadd.f32 %v292_v59, %v291_v56  ;;  %v251_v56 = vld [vmem:[%s1832_s18 + $0xd0] sm:$0xff]  ;;  %v252_v59 = vld [vmem:[%s1832_s18 + $0xd8] sm:$0xff] }
  0x63   : > { %v321_v10 = vadd.f32 %v290_v58, %v289_v57  ;;  %v249_v57 = vld [vmem:[%s1832_s18 + $0xc0] sm:$0xff]  ;;  %v250_v58 = vld [vmem:[%s1832_s18 + $0xc8] sm:$0xff]  ;;  %v316_v19 = vmul.f32 %v252_v59, %v252_v59 }
  0x67   : > { %584 = vadd.xlane.f32.xlu0 %v583_v20  ;;  %v248_v20 = vld [vmem:[%s1832_s18 + $0xb8] sm:$0xff] }
  0x68   : > { %587 = vadd.xlane.f32.xlu1 %v586_v21  ;;  %v231_v21 = vld [vmem:[%s1832_s18 + $0x30] sm:$0xff]  ;;  %v312_v38 = vmul.f32 %v248_v20, %v248_v20  ;;  %v297_v20 = vmul.f32 %v233_v6, %v233_v6 }
  0x69   : > { %578 = vadd.xlane.f32.xlu2 %v577_v22  ;;  %v232_v22 = vld [vmem:[%s1832_s18 + $0x38] sm:$0xff]  ;;  %v295_v39 = vmul.f32 %v231_v21, %v231_v21  ;;  %v298_v21 = vmul.f32 %v234_v9, %v234_v9 }
  0x6a   : > { %v296_v40 = vmul.f32 %v232_v22, %v232_v22 }
  0x6c   : > { %v330_v54 = vadd.f32 %v296_v40, %v295_v39  ;;  %v255_v39 = vld [vmem:[%s1832_s18 + $0xf0] sm:$0xff]  ;;  %v256_v40 = vld [vmem:[%s1832_s18 + $0xf8] sm:$0xff] }
  0x6f   : > { %581 = vadd.xlane.f32.xlu0 %v580_v41  ;;  %v293_v41 = vmul.f32 %v229_v29, %v229_v29 }
  0x70   : > { %346 = vadd.xlane.f32.xlu1 %v345_v43  ;;  %v354_v43 = vadd.f32 %v312_v38, %v311_v37  ;;  %v235_v37 = vld [vmem:[%s1832_s18 + $0x50] sm:$0xff]  ;;  %v236_v38 = vld [vmem:[%s1832_s18 + $0x58] sm:$0xff] }
  0x71   : > { %349 = vadd.xlane.f32.xlu2 %v348_v42  ;;  %v294_v42 = vmul.f32 %v230_v36, %v230_v36  ;;  %v333_v36 = vadd.f32 %v298_v21, %v297_v20 }
  0x73   : > { %v327_v55 = vadd.f32 %v294_v42, %v293_v41  ;;  %v253_v41 = vld [vmem:[%s1832_s18 + $0xe0] sm:$0xff]  ;;  %v254_v42 = vld [vmem:[%s1832_s18 + $0xe8] sm:$0xff] }
  0x77   : > { %322 = vadd.xlane.f32.xlu0 %v321_v10  ;;  %v315_v10 = vmul.f32 %v251_v56, %v251_v56  ;;  %v320_v56 = vmul.f32 %v256_v40, %v256_v40 }
  0x78   : > { %325 = vadd.xlane.f32.xlu1 %v324_v11  ;;  %v313_v11 = vmul.f32 %v249_v57, %v249_v57  ;;  %v317_v57 = vmul.f32 %v253_v41, %v253_v41 }
  0x79   : > { %352 = vadd.xlane.f32.xlu2 %v351_v15  ;;  %v314_v15 = vmul.f32 %v250_v58, %v250_v58  ;;  %v360_v29 = vadd.f32 %v316_v19, %v315_v10  ;;  %v318_v58 = vmul.f32 %v254_v42, %v254_v42  ;;  %v237_v10 = vld [vmem:[%s1832_s18 + $0x60] sm:$0xff]  ;;  %v240_v19 = vld [vmem:[%s1832_s18 + $0x78] sm:$0xff] }
  0x7a   : > { %v301_v20 = vmul.f32 %v237_v10, %v237_v10 }
  0x7b   : > { %v357_v22 = vadd.f32 %v314_v15, %v313_v11  ;;  %v363_v9 = vadd.f32 %v318_v58, %v317_v57  ;;  %v238_v11 = vld [vmem:[%s1832_s18 + $0x68] sm:$0xff]  ;;  %v239_v15 = vld [vmem:[%s1832_s18 + $0x70] sm:$0xff] }
  0x7c   : > { %v302_v21 = vmul.f32 %v238_v11, %v238_v11 }
  0x7f   : > { %355 = vadd.xlane.f32.xlu0 %v354_v43  ;;  %v299_v43 = vmul.f32 %v235_v37, %v235_v37  ;;  %v304_v37 = vmul.f32 %v240_v19, %v240_v19 }
  0x80   : > { %328 = vadd.xlane.f32.xlu1 %v327_v55  ;;  %v319_v55 = vmul.f32 %v255_v39, %v255_v39 }
  0x81   : > { %331 = vadd.xlane.f32.xlu2 %v330_v54  ;;  %v300_v54 = vmul.f32 %v236_v38, %v236_v38  ;;  %v339_v38 = vadd.f32 %v302_v21, %v301_v20 }
  0x82   : > { %v366_v6 = vadd.f32 %v320_v56, %v319_v55 }
  0x83   : > { %v336_v59 = vadd.f32 %v300_v54, %v299_v43 }
  0x87   : > { %358 = vadd.xlane.f32.xlu0 %v357_v22  ;;  %v303_v22 = vmul.f32 %v239_v15, %v239_v15 }
  0x88   : > { %361 = vadd.xlane.f32.xlu1 %v360_v29 }
  0x89   : > { %334 = vadd.xlane.f32.xlu2 %v333_v36  ;;  %v342_v29 = vadd.f32 %v304_v37, %v303_v22 }
  0x8f   : > { %337 = vadd.xlane.f32.xlu0 %v336_v59 }
  0x90   : > { %364 = vadd.xlane.f32.xlu1 %v363_v9 }
  0x91   : > { %367 = vadd.xlane.f32.xlu2 %v366_v6 }
  0x97   : > { %340 = vadd.xlane.f32.xlu0 %v339_v38 }
  0x98   : > { %343 = vadd.xlane.f32.xlu1 %v342_v29 }
  0xba   : > { %v621_v36 = vpop.xlane.xlu0 %620 }
  0xbb   : > { %v639_v39 = vmax.f32 %v621_v36, 1e-24  ;;  %v615_v40 = vpop.xlane.xlu1 %614 }
  0xbc   : > { %v609_v41 = vpop.xlane.xlu2 %608  ;;  %v2069_v42 = vmax.f32 %v615_v40, 1e-24 }
  0xbd   : > { %1333 = vrsqrt.f32 %v639_v39  ;;  %v2072_v43 = vmax.f32 %v609_v41, 1e-24  ;;  %vm787_vm1 = vweird.f32 %v639_v39 }
  0xbe   : > { %1335 = vrsqrt.f32 %v2069_v42  ;;  %vm767_vm5 = vweird.f32 %v2069_v42 }
  0xbf   : > { %1337 = vrsqrt.f32 %v2072_v43  ;;  %vm747_vm14 = vweird.f32 %v2072_v43 }
  0xc2   : > { %v624_v54 = vpop.xlane.xlu0 %623 }
  0xc3   : > { %v1334_v55 = vpop.eup %1333  ;;  %v640_v56 = vmax.f32 %v624_v54, 1e-24  ;;  %v618_v57 = vpop.xlane.xlu1 %617 }
  0xc4   : > { %v612_v58 = vpop.xlane.xlu2 %611  ;;  %v2074_v59 = vpop.eup %1335  ;;  %v782_v6 = vmul.f32 %v1334_v55, %v639_v39  ;;  %v2077_v9 = vmax.f32 %v618_v57, 1e-24  ;;  %vm788_vm0 = vweird.f32 %v1334_v55 }
  0xc5   : > { %v2079_v10 = vmax.f32 %v612_v58, 1e-24  ;;  %1339 = vrsqrt.f32 %v640_v56  ;;  %v762_v15 = vmul.f32 %v2074_v59, %v2069_v42  ;;  %v2085_v20 = vpop.eup %1337  ;;  %vm789_vm2 = vmor %vm787_vm1, %vm788_vm0  ;;  %vm797_vm4 = vweird.f32 %v640_v56 }
  0xc6   : > { %v783_v11 = vmul.f32 %v1334_v55, %v782_v6  ;;  %1341 = vrsqrt.f32 %v2077_v9  ;;  %v742_v58 = vmul.f32 %v2085_v20, %v2072_v43  ;;  %vm777_vm7 = vweird.f32 %v2077_v9 }
  0xc7   : > { %1343 = vrsqrt.f32 %v2079_v10  ;;  %v763_v38 = vmul.f32 %v2074_v59, %v762_v15  ;;  %vm768_vm9 = vweird.f32 %v2074_v59  ;;  %vm757_vm12 = vweird.f32 %v2079_v10 }
  0xc8   : > { %v784_v19 = vmul.f32 0.5, %v783_v11  ;;  %v743_v25 = vmul.f32 %v2085_v20, %v742_v58  ;;  %vm769_vm11 = vmor %vm767_vm5, %vm768_vm9  ;;  %vm748_vm15 = vweird.f32 %v2085_v20 }
  0xc9   : > { %v764_v15 = vmul.f32 0.5, %v763_v38  ;;  %vm2179_vm1 = vmor %vm747_vm14, %vm748_vm15 }
  0xca   : > { %v603_v21 = vpop.xlane.xlu0 %602  ;;  %v785_v37 = vsub.f32 1.5, %v784_v19 }
  0xcb   : > { %v1340_v22 = vpop.eup %1339  ;;  %v606_v29 = vpop.xlane.xlu1 %605  ;;  %v2090_v54 = vmax.f32 %v603_v21, 1e-24  ;;  %v765_v51 = vsub.f32 1.5, %v764_v15 }
  0xcc   : > { %v597_v36 = vpop.xlane.xlu2 %596  ;;  %v2088_v40 = vpop.eup %1341  ;;  %v792_v41 = vmul.f32 %v1340_v22, %v640_v56  ;;  %v2098_v11 = vmax.f32 %v606_v29, 1e-24  ;;  %v786_v28 = vmul.f32 %v1334_v55, %v785_v37  ;;  %vm798_vm3 = vweird.f32 %v1340_v22 }
  0xcd   : > { %v2092_v57 = vpop.eup %1343  ;;  %v772_v6 = vmul.f32 %v2088_v40, %v2077_v9  ;;  %1345 = vrsqrt.f32 %v2090_v54  ;;  %v2104_v52 = vmax.f32 %v597_v36, 1e-24  ;;  %vm799_vm6 = vmor %vm797_vm4, %vm798_vm3  ;;  %vm778_vm8 = vweird.f32 %v2088_v40 }
  0xce   : > { %v793_v19 = vmul.f32 %v1340_v22, %v792_v41  ;;  %v752_v21 = vmul.f32 %v2092_v57, %v2079_v10  ;;  %1347 = vrsqrt.f32 %v2098_v11  ;;  %vm779_vm10 = vmor %vm777_vm7, %vm778_vm8  ;;  %vm758_vm13 = vweird.f32 %v2092_v57 }
  0xcf   : > { %v773_v26 = vmul.f32 %v2088_v40, %v772_v6  ;;  %v790_v6 = vsel %vm789_vm2, %v1334_v55, %v786_v28  ;;  %1349 = vrsqrt.f32 %v2104_v52  ;;  %vm2163_vm0 = vmor %vm757_vm12, %vm758_vm13  ;;  %vm727_vm2 = vweird.f32 %v2090_v54 }
  0xd0   : > { %v794_v53 = vmul.f32 0.5, %v793_v19  ;;  %v753_v36 = vmul.f32 %v2092_v57, %v752_v21  ;;  %vm737_vm3 = vweird.f32 %v2098_v11  ;;  %vm707_vm5 = vweird.f32 %v2104_v52 }
  0xd1   : > { %v774_v27 = vmul.f32 0.5, %v773_v26  ;;  %v744_v26 = vmul.f32 0.5, %v743_v25  ;;  %v878_v25 = vmul.f32 %v790_v6, %v1849_v1 }
  0xd2   : > { %v795_v29 = vsub.f32 1.5, %v794_v53  ;;  %v600_v38 = vpop.xlane.xlu0 %599  ;;  %v877_v53 = vmul.f32 %v790_v6, %v1846_v0 }
  0xd3   : > { %v775_v37 = vsub.f32 1.5, %v774_v27  ;;  %v2108_v41 = vmax.f32 %v600_v38, 1e-24  ;;  %v591_v46 = vpop.xlane.xlu1 %590  ;;  %v2115_v27 = vpop.eup %1345 }
  0xd4   : > { %v594_v19 = vpop.xlane.xlu2 %593  ;;  %v796_v39 = vmul.f32 %v1340_v22, %v795_v29  ;;  %v2121_v56 = vpop.eup %1347  ;;  %v754_v29 = vmul.f32 0.5, %v753_v36  ;;  %v2128_v38 = vmax.f32 %v591_v46, 1e-24  ;;  %v722_v0 = vmul.f32 %v2115_v27, %v2090_v54 }
  0xd5   : > { %1351 = vrsqrt.f32 %v2108_v41  ;;  %v2119_v55 = vmax.f32 %v594_v19, 1e-24  ;;  %v776_v21 = vmul.f32 %v2088_v40, %v775_v37  ;;  %v2133_v24 = vpop.eup %1349  ;;  %v732_v1 = vmul.f32 %v2121_v56, %v2098_v11 }
  0xd6   : > { %v800_v28 = vsel %vm799_vm6, %v1340_v22, %v796_v39  ;;  %v766_v22 = vmul.f32 %v2074_v59, %v765_v51  ;;  %v755_v9 = vsub.f32 1.5, %v754_v29  ;;  %v723_v36 = vmul.f32 %v2115_v27, %v722_v0 }
  0xd7   : > { %v879_v58 = vmul.f32 %v800_v28, %v1876_v12  ;;  %v880_v15 = vmul.f32 %v800_v28, %v1879_v13  ;;  %1353 = vrsqrt.f32 %v2119_v55  ;;  %v745_v13 = vsub.f32 1.5, %v744_v26 }
  0xd8   : > { %v780_v46 = vsel %vm779_vm10, %v2088_v40, %v776_v21  ;;  %1355 = vrsqrt.f32 %v2128_v38  ;;  %v770_v42 = vsel %vm769_vm11, %v2074_v59, %v766_v22  ;;  %v702_v40 = vmul.f32 %v2133_v24, %v2104_v52 }
  0xd9   : > { %v911_v19 = vpack.c.bf16 %v879_v58, %v877_v53  ;;  %v912_v39 = vpack.c.bf16 %v880_v15, %v878_v25  ;;  %v875_v26 = vmul.f32 %v780_v46, %v1882_v14  ;;  %v733_v28 = vmul.f32 %v2121_v56, %v732_v1 }
  0xda   : > { %v585_v12 = vpop.xlane.xlu0 %584  ;;  %v876_v58 = vmul.f32 %v780_v46, %v1885_v16  ;;  %v873_v15 = vmul.f32 %v770_v42, %v1852_v2  ;;  %v874_v29 = vmul.f32 %v770_v42, %v1859_v5  ;;  %v746_v22 = vmul.f32 %v2085_v20, %v745_v13 }
  0xdb   : > { %913 = vmatpush.bf16.xpose.msra.mxu0 %v911_v19  ;;  %1180 = vmatpush.bf16.xpose.msra.mxu2 %v911_v19  ;;  %v588_v51 = vpop.xlane.xlu1 %587  ;;  %v2146_v37 = vpop.eup %1351  ;;  %v2158_v53 = vmax.f32 %v585_v12, 1e-24  ;;  %v756_v16 = vmul.f32 %v2092_v57, %v755_v9  ;;  %v724_v0 = vmul.f32 0.5, %v723_v36  ;;  %v703_v19 = vmul.f32 %v2133_v24, %v702_v40 }
  0xdc   : > { %962 = vmatpush.bf16.xpose.msra.mxu1 %v912_v39  ;;  %1188 = vmatpush.bf16.xpose.msra.mxu3 %v912_v39  ;;  %v579_v6 = vpop.xlane.xlu2 %578  ;;  %v712_v25 = vmul.f32 %v2146_v37, %v2108_v41  ;;  %v2170_v14 = vmax.f32 %v588_v51, 1e-24  ;;  %v909_v2 = vpack.c.bf16 %v875_v26, %v873_v15  ;;  %v734_v1 = vmul.f32 0.5, %v733_v28 }
  0xdd   : > { %v2172_v21 = vpop.eup %1353  ;;  %1357 = vrsqrt.f32 %v2158_v53  ;;  %v910_v5 = vpack.c.bf16 %v876_v58, %v874_v29  ;;  %v760_v13 = vsel %vm2163_vm0, %v2092_v57, %v756_v16  ;;  %vm728_vm4 = vweird.f32 %v2115_v27 }
  0xde   : > { %v2184_v39 = vpop.eup %1355  ;;  %v713_v43 = vmul.f32 %v2146_v37, %v712_v25  ;;  %v692_v46 = vmul.f32 %v2172_v21, %v2119_v55  ;;  %1359 = vrsqrt.f32 %v2170_v14  ;;  %v750_v57 = vsel %vm2179_vm1, %v2085_v20, %v746_v22  ;;  %vm2224_vm10 = vmor %vm727_vm2, %vm728_vm4 }
  0xdf   : > { %vm738_vm6 = vweird.f32 %v2121_v56  ;;  %v704_v9 = vmul.f32 0.5, %v703_v19  ;;  %v682_v42 = vmul.f32 %v2184_v39, %v2128_v38  ;;  %v871_v36 = vmul.f32 %v760_v13, %v1888_v17 }
  0xe0   : > { %v735_v40 = vsub.f32 1.5, %v734_v1  ;;  %v725_v26 = vsub.f32 1.5, %v724_v0  ;;  %v2205_v28 = vmax.f32 %v579_v6, 1e-24  ;;  %v872_v58 = vmul.f32 %v760_v13, %v1891_v18  ;;  %vm2235_vm11 = vmor %vm737_vm3, %vm738_vm6 }
  0xe1   : > { %v714_v25 = vmul.f32 0.5, %v713_v43  ;;  %vm717_vm7 = vweird.f32 %v2108_v41  ;;  %v693_v20 = vmul.f32 %v2172_v21, %v692_v46  ;;  %v869_v15 = vmul.f32 %v750_v57, %v1864_v7 }
  0xe2   : > { %v582_v12 = vpop.xlane.xlu0 %581  ;;  %vm718_vm8 = vweird.f32 %v2146_v37  ;;  %vm708_vm9 = vweird.f32 %v2133_v24  ;;  %v870_v6 = vmul.f32 %v750_v57, %v1867_v8  ;;  %v705_v7 = vsub.f32 1.5, %v704_v9 }
  0xe3   : > { %914 = vmatpush.bf16.xpose.msra.mxu0 %v909_v2  ;;  %1181 = vmatpush.bf16.xpose.msra.mxu2 %v909_v2  ;;  %v347_v51 = vpop.xlane.xlu1 %346  ;;  %v2211_v29 = vpop.eup %1357  ;;  %v2215_v17 = vmax.f32 %v582_v12, 1e-24  ;;  %v683_v16 = vmul.f32 %v2184_v39, %v682_v42  ;;  %v907_v10 = vpack.c.bf16 %v871_v36, %v869_v15  ;;  %1361 = vrsqrt.f32 %v2205_v28  ;;  %vm2267_vm12 = vmor %vm707_vm5, %vm708_vm9 }
  0xe4   : > { %963 = vmatpush.bf16.xpose.msra.mxu1 %v910_v5  ;;  %1189 = vmatpush.bf16.xpose.msra.mxu3 %v910_v5  ;;  %v350_v59 = vpop.xlane.xlu2 %349  ;;  %v2218_v22 = vpop.eup %1359  ;;  %v908_v54 = vpack.c.bf16 %v872_v58, %v870_v6  ;;  %v726_v19 = vmul.f32 %v2115_v27, %v725_v26  ;;  %v736_v2 = vmul.f32 %v2121_v56, %v735_v40  ;;  %v715_v5 = vsub.f32 1.5, %v714_v25  ;;  %vm2281_vm13 = vmor %vm717_vm7, %vm718_vm8 }
  0xe5   : > { %v2229_v0 = vmax.f32 %v350_v59, 1e-24  ;;  %v694_v12 = vmul.f32 0.5, %v693_v20  ;;  %v662_v13 = vmul.f32 %v2211_v29, %v2158_v53  ;;  %v2244_v11 = vmax.f32 %v347_v51, 1e-24 }
  0xe6   : > { %v672_v43 = vmul.f32 %v2218_v22, %v2170_v14  ;;  %1363 = vrsqrt.f32 %v2215_v17  ;;  %v730_v46 = vsel %vm2224_vm10, %v2115_v27, %v726_v19  ;;  %v684_v42 = vmul.f32 0.5, %v683_v16 }
  0xe7   : > { %1365 = vrsqrt.f32 %v2229_v0  ;;  %v740_v51 = vsel %vm2235_vm11, %v2121_v56, %v736_v2  ;;  %v865_v36 = vmul.f32 %v730_v46, %v1909_v31  ;;  %v866_v26 = vmul.f32 %v730_v46, %v1912_v32 }
  0xe8   : > { %v867_v40 = vmul.f32 %v740_v51, %v1906_v30  ;;  %v868_v58 = vmul.f32 %v740_v51, %v1915_v33  ;;  %v706_v27 = vmul.f32 %v2133_v24, %v705_v7  ;;  %1367 = vrsqrt.f32 %v2244_v11 }
  0xe9   : > { %v716_v30 = vmul.f32 %v2146_v37, %v715_v5  ;;  %v2275_v32 = vpop.eup %1361  ;;  %v663_v52 = vmul.f32 %v2211_v29, %v662_v13  ;;  %v673_v25 = vmul.f32 %v2218_v22, %v672_v43  ;;  %v695_v20 = vsub.f32 1.5, %v694_v12 }
  0xea   : > { %v323_v1 = vpop.xlane.xlu0 %322  ;;  %v905_v15 = vpack.c.bf16 %v867_v40, %v865_v36  ;;  %v685_v18 = vsub.f32 1.5, %v684_v42  ;;  %v906_v7 = vpack.c.bf16 %v868_v58, %v866_v26  ;;  %v710_v41 = vsel %vm2267_vm12, %v2133_v24, %v706_v27 }
  0xeb   : > { %915 = vmatpush.bf16.xpose.msra.mxu0 %v907_v10  ;;  %1182 = vmatpush.bf16.xpose.msra.mxu2 %v907_v10  ;;  %v326_v57 = vpop.xlane.xlu1 %325  ;;  %v2252_v9 = vmax.f32 %v323_v1, 1e-24  ;;  %vm697_vm14 = vweird.f32 %v2119_v55  ;;  %vm698_vm15 = vweird.f32 %v2172_v21  ;;  %vm687_vm0 = vweird.f32 %v2128_v38 }
  0xec   : > { %964 = vmatpush.bf16.xpose.msra.mxu1 %v908_v54  ;;  %1190 = vmatpush.bf16.xpose.msra.mxu3 %v908_v54  ;;  %v2272_v56 = vmax.f32 %v326_v57, 1e-24  ;;  %v353_v31 = vpop.xlane.xlu2 %352  ;;  %v2288_v6 = vpop.eup %1363  ;;  %v720_v10 = vsel %vm2281_vm13, %v2146_v37, %v716_v30  ;;  %vm688_vm1 = vweird.f32 %v2184_v39  ;;  %v664_v8 = vmul.f32 0.5, %v663_v52  ;;  %vm2320_vm2 = vmor %vm697_vm14, %vm698_vm15 }
  0xed   : > { %1369 = vrsqrt.f32 %v2252_v9  ;;  %v2294_v16 = vpop.eup %1365  ;;  %v2303_v54 = vmul.f32 0.5, %v673_v25  ;;  %v642_v24 = vmul.f32 %v2275_v32, %v2205_v28  ;;  %v652_v1 = vmul.f32 %v2288_v6, %v2215_v17  ;;  %vm2333_vm3 = vmor %vm687_vm0, %vm688_vm1 }
  0xee   : > { %1371 = vrsqrt.f32 %v2272_v56  ;;  %v2307_v2 = vpop.eup %1367  ;;  %v861_v5 = vmul.f32 %v710_v41, %v1918_v34  ;;  %v863_v37 = vmul.f32 %v720_v10, %v1936_v44  ;;  %v862_v12 = vmul.f32 %v710_v41, %v1921_v35 }
  0xef   : > { %v864_v46 = vmul.f32 %v720_v10, %v1939_v45  ;;  %v2325_v57 = vmax.f32 %v353_v31, 1e-24  ;;  %v686_v34 = vmul.f32 %v2184_v39, %v685_v18  ;;  %v696_v44 = vmul.f32 %v2172_v21, %v695_v20 }
  0xf0   : > { %vm667_vm4 = vweird.f32 %v2158_v53  ;;  %vm677_vm5 = vweird.f32 %v2170_v14  ;;  %v476_v45 = vmul.f32 %v2294_v16, %v2229_v0  ;;  %v665_v51 = vsub.f32 1.5, %v664_v8 }
  0xf1   : > { %vm668_vm6 = vweird.f32 %v2211_v29  ;;  %v675_v38 = vsub.f32 1.5, %v2303_v54  ;;  %v643_v36 = vmul.f32 %v2275_v32, %v642_v24  ;;  %v653_v26 = vmul.f32 %v2288_v6, %v652_v1 }
  0xf2   : > { %v356_v19 = vpop.xlane.xlu0 %355  ;;  %v466_v58 = vmul.f32 %v2307_v2, %v2244_v11  ;;  %v903_v59 = vpack.c.bf16 %v863_v37, %v861_v5  ;;  %v904_v31 = vpack.c.bf16 %v864_v46, %v862_v12  ;;  %1373 = vrsqrt.f32 %v2325_v57  ;;  %vm2380_vm11 = vmor %vm667_vm4, %vm668_vm6 }
  0xf3   : > { %916 = vmatpush.bf16.xpose.msra.mxu0 %v905_v15  ;;  %1183 = vmatpush.bf16.xpose.msra.mxu2 %v905_v15  ;;  %v2314_v13 = vpop.eup %1369  ;;  %v2341_v55 = vmax.f32 %v356_v19, 1e-24  ;;  %v329_v40 = vpop.xlane.xlu1 %328  ;;  %v690_v33 = vsel %vm2333_vm3, %v2184_v39, %v686_v34  ;;  %v700_v52 = vsel %vm2320_vm2, %v2172_v21, %v696_v44  ;;  %vm647_vm7 = vweird.f32 %v2205_v28 }
  0xf4   : > { %965 = vmatpush.bf16.xpose.msra.mxu1 %v906_v7  ;;  %1191 = vmatpush.bf16.xpose.msra.mxu3 %v906_v7  ;;  %v2343_v42 = vpop.eup %1371  ;;  %v386_v27 = vmul.f32 %v2314_v13, %v2252_v9  ;;  %v332_v30 = vpop.xlane.xlu2 %331  ;;  %v477_v25 = vmul.f32 %v2294_v16, %v476_v45  ;;  %v2365_v15 = vmax.f32 %v329_v40, 1e-24  ;;  %vm678_vm8 = vweird.f32 %v2218_v22 }
  0xf5   : > { %v396_v20 = vmul.f32 %v2343_v42, %v2272_v56  ;;  %1375 = vrsqrt.f32 %v2341_v55  ;;  %v644_v39 = vmul.f32 0.5, %v643_v36  ;;  %vm648_vm9 = vweird.f32 %v2275_v32  ;;  %vm2391_vm12 = vmor %vm677_vm5, %vm678_vm8 }
  0xf6   : > { %vm657_vm10 = vweird.f32 %v2215_v17  ;;  %v2370_v21 = vmax.f32 %v332_v30, 1e-24  ;;  %v467_v18 = vmul.f32 %v2307_v2, %v466_v58  ;;  %v387_v7 = vmul.f32 %v2314_v13, %v386_v27  ;;  %vm2430_vm4 = vmor %vm647_vm7, %vm648_vm9 }
  0xf7   : > { %v857_v41 = vmul.f32 %v690_v33, %v1948_v49  ;;  %v859_v10 = vmul.f32 %v700_v52, %v1942_v47  ;;  %v654_v54 = vmul.f32 0.5, %v653_v26  ;;  %v858_v24 = vmul.f32 %v690_v33, %v1951_v50 }
  0xf8   : > { %v860_v19 = vmul.f32 %v700_v52, %v1945_v48  ;;  %v666_v1 = vmul.f32 %v2211_v29, %v665_v51  ;;  %v478_v49 = vmul.f32 0.5, %v477_v25  ;;  %v397_v53 = vmul.f32 %v2343_v42, %v396_v20  ;;  %v2398_v37 = vpop.eup %1373 }
  0xf9   : > { %1377 = vrsqrt.f32 %v2365_v15  ;;  %v676_v50 = vmul.f32 %v2218_v22, %v675_v38  ;;  %vm658_vm13 = vweird.f32 %v2288_v6  ;;  %vm481_vm14 = vweird.f32 %v2229_v0 }
  0xfa   : > { %v359_v5 = vpop.xlane.xlu0 %358  ;;  %vm471_vm15 = vweird.f32 %v2244_v11  ;;  %1379 = vrsqrt.f32 %v2370_v21  ;;  %v645_v14 = vsub.f32 1.5, %v644_v39  ;;  %v468_v12 = vmul.f32 0.5, %v467_v18  ;;  %vm2442_vm5 = vmor %vm657_vm10, %vm658_vm13  ;;  %v1404_v11 = vld [vmem:[%s1832_s18 + $0xb8] sm:$0xff] }
  0xfb   : > { %917 = vmatpush.bf16.xpose.msra.mxu0 %v903_v59  ;;  %1184 = vmatpush.bf16.xpose.msra.mxu2 %v903_v59  ;;  %v2404_v48 = vpop.eup %1375  ;;  %v388_v43 = vmul.f32 0.5, %v387_v7  ;;  %v901_v46 = vpack.c.bf16 %v859_v10, %v857_v41  ;;  %v655_v34 = vsub.f32 1.5, %v654_v54  ;;  %v902_v44 = vpack.c.bf16 %v860_v19, %v858_v24  ;;  %v2932_v10 = vld [vmem:[#allocation25_spill] sm:$0xff] }
  0xfc   : > { %966 = vmatpush.bf16.xpose.msra.mxu1 %v904_v31  ;;  %1192 = vmatpush.bf16.xpose.msra.mxu3 %v904_v31  ;;  %v670_v35 = vsel %vm2380_vm11, %v2211_v29, %v666_v1  ;;  %v680_v45 = vsel %vm2391_vm12, %v2218_v22, %v676_v50  ;;  %v479_v51 = vsub.f32 1.5, %v478_v49  ;;  %vm482_vm0 = vweird.f32 %v2294_v16  ;;  %v362_v22 = vpop.xlane.xlu1 %361  ;;  %v335_v20 = vpop.xlane.xlu2 %334  ;;  %v2927_v31 = vld [vmem:[#allocation23_spill] sm:$0xff] }
  0xfd   : > { %vm472_vm1 = vweird.f32 %v2307_v2  ;;  %v398_v38 = vmul.f32 0.5, %v397_v53  ;;  %vm401_vm2 = vweird.f32 %v2272_v56  ;;  %vm391_vm3 = vweird.f32 %v2252_v9  ;;  %vm2460_vm7 = vmor %vm481_vm14, %vm482_vm0 }
  0xfe   : > { %v486_v36 = vmul.f32 %v2398_v37, %v2325_v57  ;;  %v496_v29 = vmul.f32 %v2404_v48, %v2341_v55  ;;  %v469_v26 = vsub.f32 1.5, %v468_v12  ;;  %v389_v58 = vsub.f32 1.5, %v388_v43  ;;  %vm2473_vm9 = vmor %vm471_vm15, %vm472_vm1 }
  0xff   : > { %v2420_v40 = vpop.eup %1377  ;;  %v853_v27 = vmul.f32 %v670_v35, %v1966_v60  ;;  %v855_v59 = vmul.f32 %v680_v45, %v1972_v62  ;;  %v854_v33 = vmul.f32 %v670_v35, %v1969_v61  ;;  %v856_v52 = vmul.f32 %v680_v45, %v1975_v63  ;;  %v2929_v62 = vld [vmem:[#allocation20_spill] sm:$0xff] }
 0x100   : > { %v2424_v30 = vpop.eup %1379  ;;  %v646_v25 = vmul.f32 %v2275_v32, %v645_v14  ;;  %v656_v60 = vmul.f32 %v2288_v6, %v655_v34  ;;  %v480_v28 = vmul.f32 %v2294_v16, %v479_v51  ;;  %v399_v39 = vsub.f32 1.5, %v398_v38  ;;  %v2926_v34 = vld [vmem:[#allocation17_spill] sm:$0xff] }
 0x101   : > { %vm392_vm6 = vweird.f32 %v2314_v13  ;;  %v2448_v61 = vmax.f32 %v362_v22, 1e-24  ;;  %v487_v63 = vmul.f32 %v2398_v37, %v486_v36  ;;  %v497_v18 = vmul.f32 %v2404_v48, %v496_v29 }
 0x102   : > { %v406_v7 = vmul.f32 %v2420_v40, %v2365_v15  ;;  %v2454_v41 = vmax.f32 %v359_v5, 1e-24  ;;  %v338_v17 = vpop.xlane.xlu0 %337  ;;  %vm402_vm8 = vweird.f32 %v2343_v42  ;;  %v416_v8 = vmul.f32 %v2424_v30, %v2370_v21  ;;  %vm2490_vm10 = vmor %vm391_vm3, %vm392_vm6 }
 0x103   : > { %918 = vmatpush.bf16.xpose.msra.mxu0 %v901_v46  ;;  %1185 = vmatpush.bf16.xpose.msra.mxu2 %v901_v46  ;;  %v899_v54 = vpack.c.bf16 %v855_v59, %v853_v27  ;;  %v2467_v24 = vmax.f32 %v335_v20, 1e-24  ;;  %v390_v0 = vmul.f32 %v2314_v13, %v389_v58  ;;  %v900_v1 = vpack.c.bf16 %v856_v52, %v854_v33  ;;  %vm2501_vm11 = vmor %vm401_vm2, %vm402_vm8 }
 0x104   : > { %967 = vmatpush.bf16.xpose.msra.mxu1 %v902_v44  ;;  %1193 = vmatpush.bf16.xpose.msra.mxu3 %v902_v44  ;;  %v650_v5 = vsel %vm2430_vm4, %v2275_v32, %v646_v25  ;;  %v660_v47 = vsel %vm2442_vm5, %v2288_v6, %v656_v60  ;;  %v470_v49 = vmul.f32 %v2307_v2, %v469_v26  ;;  %1381 = vrsqrt.f32 %v2448_v61  ;;  %v2517_v45 = vpop.xlane.xlu1 %364  ;;  %v2928_v60 = vld [vmem:[#allocation22_spill] sm:$0xff] }
 0x105   : > { %v400_v53 = vmul.f32 %v2343_v42, %v399_v39  ;;  %v2495_v32 = vmax.f32 %v338_v17, 1e-24  ;;  %v488_v50 = vmul.f32 0.5, %v487_v63  ;;  %v498_v9 = vmul.f32 0.5, %v497_v18  ;;  %v2930_v39 = vld [vmem:[#allocation18_spill] sm:$0xff] }
 0x106   : > { %v407_v14 = vmul.f32 %v2420_v40, %v406_v7  ;;  %1383 = vrsqrt.f32 %v2454_v41  ;;  %v417_v12 = vmul.f32 %v2424_v30, %v416_v8  ;;  %v849_v43 = vmul.f32 %v650_v5, %v1978_v3  ;;  %v2931_v7 = vld [vmem:[#allocation24_spill] sm:$0xff] }
 0x107   : > { %v851_v46 = vmul.f32 %v660_v47, %v1996_v23  ;;  %1385 = vrsqrt.f32 %v2467_v24  ;;  %v850_v56 = vmul.f32 %v650_v5, %v1981_v4  ;;  %v852_v44 = vmul.f32 %v660_v47, %v2926_v34  ;;  %v2934_v5 = vld [vmem:[#allocation19_spill] sm:$0xff] }
 0x108   : > { %1387 = vrsqrt.f32 %v2495_v32  ;;  %v394_v35 = vsel %vm2490_vm10, %v2314_v13, %v390_v0  ;;  %v404_v3 = vsel %vm2501_vm11, %v2343_v42, %v400_v53  ;;  %v474_v23 = vsel %vm2473_vm9, %v2307_v2, %v470_v49  ;;  %v368_v49 = vpop.xlane.xlu2 %367 }
 0x109   : > { %v801_v51 = vmul.f32 0.5, %v394_v35  ;;  %v484_v4 = vsel %vm2460_vm7, %v2294_v16, %v480_v28  ;;  %vm491_vm12 = vweird.f32 %v2325_v57  ;;  %v408_v38 = vmul.f32 0.5, %v407_v14 }
 0x10a   : > { %v802_v36 = vmul.f32 0.5, %v404_v3  ;;  %v809_v13 = vmul.f32 0.5, %v474_v23  ;;  %v2529_v29 = vpop.eup %1381  ;;  %vm501_vm13 = vweird.f32 %v2341_v55  ;;  %v418_v22 = vmul.f32 0.5, %v417_v12  ;;  %v341_v3 = vpop.xlane.xlu0 %340 }
 0x10b   : > { %919 = vmatpush.bf16.xpose.msra.mxu0 %v899_v54  ;;  %1186 = vmatpush.bf16.xpose.msra.mxu2 %v899_v54  ;;  %v897_v42 = vpack.c.bf16 %v851_v46, %v849_v43  ;;  %v810_v26 = vmul.f32 0.5, %v484_v4  ;;  %vm492_vm14 = vweird.f32 %v2398_v37  ;;  %vm421_vm15 = vweird.f32 %v2370_v21  ;;  %v2933_v54 = vld [vmem:[#allocation21_spill] sm:$0xff] }
 0x10c   : > { %968 = vmatpush.bf16.xpose.msra.mxu1 %v900_v1  ;;  %1194 = vmatpush.bf16.xpose.msra.mxu3 %v900_v1  ;;  %v2532_v58 = vpop.eup %1383  ;;  %vm411_vm0 = vweird.f32 %v2365_v15  ;;  %v898_v16 = vpack.c.bf16 %v852_v44, %v850_v56  ;;  %v489_v27 = vsub.f32 1.5, %v488_v50  ;;  %v499_v59 = vsub.f32 1.5, %v498_v9  ;;  %vm2560_vm3 = vmor %vm491_vm12, %vm492_vm14  ;;  %v344_v46 = vpop.xlane.xlu1 %343 }
 0x10d   : > { %v2537_v2 = vpop.eup %1385  ;;  %vm502_vm1 = vweird.f32 %v2404_v48  ;;  %v817_v33 = vmul.f32 %v801_v51, %v2927_v31  ;;  %v409_v25 = vsub.f32 1.5, %v408_v38  ;;  %v819_v20 = vmul.f32 %v802_v36, %v2928_v60 }
 0x10e   : > { %v2541_v52 = vpop.eup %1387  ;;  %v833_v28 = vmul.f32 %v809_v13, %v2929_v62  ;;  %v835_v63 = vmul.f32 %v810_v26, %v2930_v39  ;;  %v419_v18 = vsub.f32 1.5, %v418_v22  ;;  %v818_v17 = vmul.f32 %v801_v51, %v2931_v7  ;;  %vm2574_vm5 = vmor %vm501_vm13, %vm502_vm1  ;;  %v1397_v39 = vld [vmem:[%s1832_s18 + $0x20] sm:$0xff] }
 0x10f   : > { %v820_v8 = vmul.f32 %v802_v36, %v2932_v10  ;;  %v834_v19 = vmul.f32 %v809_v13, %v2933_v54  ;;  %vm412_vm2 = vweird.f32 %v2420_v40  ;;  %v516_v0 = vmul.f32 %v2529_v29, %v2448_v61 }
 0x110   : > { %v506_v1 = vmul.f32 %v2532_v58, %v2454_v41  ;;  %v836_v47 = vmul.f32 %v810_v26, %v2934_v5  ;;  %v490_v53 = vmul.f32 %v2398_v37, %v489_v27  ;;  %vm422_vm4 = vweird.f32 %v2424_v30  ;;  %vm2584_vm6 = vmor %vm411_vm0, %vm412_vm2  ;;  %v1402_v5 = vld [vmem:[%s1832_s18 + $0x38] sm:$0xff] }
 0x111   : > { %v426_v6 = vmul.f32 %v2537_v2, %v2467_v24  ;;  %v436_v50 = vmul.f32 %v2541_v52, %v2495_v32  ;;  %v500_v9 = vmul.f32 %v2404_v48, %v499_v59  ;;  %v410_v14 = vmul.f32 %v2420_v40, %v409_v25  ;;  %vm2594_vm7 = vmor %vm421_vm15, %vm422_vm4 }
 0x112   : > { %v881_v12 = vpack.c.bf16 %v819_v20, %v817_v33  ;;  %v889_v43 = vpack.c.bf16 %v835_v63, %v833_v28  ;;  %v420_v56 = vmul.f32 %v2424_v30, %v419_v18  ;;  %v882_v55 = vpack.c.bf16 %v820_v8, %v818_v17  ;;  %v1398_v18 = vld [vmem:[%s1832_s18 + $0x30] sm:$0xff]  ;;  %v1399_v17 = vld [vmem:[%s1832_s18 + $0xa0] sm:$0xff] }
 0x113   : > { %920 = vmatpush.bf16.xpose.msra.mxu0 %v897_v42  ;;  %1187 = vmatpush.bf16.xpose.msra.mxu2 %v897_v42  ;;  %v890_v44 = vpack.c.bf16 %v836_v47, %v834_v19  ;;  %v2588_v35 = vmax.f32 %v368_v49, 1e-24  ;;  %v517_v23 = vmul.f32 %v2529_v29, %v516_v0  ;;  %v507_v15 = vmul.f32 %v2532_v58, %v506_v1  ;;  %v1400_v8 = vld [vmem:[%s1832_s18 + $0xb0] sm:$0xff]  ;;  %v1401_v0 = vld [vmem:[%s1832_s18 + $0x28] sm:$0xff] }
 0x114   : > { %969 = vmatpush.bf16.xpose.msra.mxu1 %v898_v16  ;;  %1195 = vmatpush.bf16.xpose.msra.mxu3 %v898_v16  ;;  %v2601_v4 = vmax.f32 %v2517_v45, 1e-24  ;;  %v427_v38 = vmul.f32 %v2537_v2, %v426_v6  ;;  %v437_v36 = vmul.f32 %v2541_v52, %v436_v50  ;;  %v2605_v21 = vmax.f32 %v344_v46, 1e-24  ;;  %v1403_v49 = vld [vmem:[%s1832_s18 + $0xa8] sm:$0xff] }
 0x115   : > { %v2607_v13 = vmax.f32 %v341_v3, 1e-24  ;;  %v414_v22 = vsel %vm2584_vm6, %v2420_v40, %v410_v14  ;;  %1389 = vrsqrt.f32 %v2588_v35  ;;  %v424_v45 = vsel %vm2594_vm7, %v2424_v30, %v420_v56 }
 0x116   : > { %v494_v42 = vsel %vm2560_vm3, %v2398_v37, %v490_v53  ;;  %v504_v26 = vsel %vm2574_vm5, %v2404_v48, %v500_v9  ;;  %v518_v16 = vmul.f32 0.5, %v517_v23  ;;  %v508_v27 = vmul.f32 0.5, %v507_v15 }
 0x117   : > { %1391 = vrsqrt.f32 %v2601_v4  ;;  %v428_v59 = vmul.f32 0.5, %v427_v38  ;;  %v438_v40 = vmul.f32 0.5, %v437_v36  ;;  %v803_v31 = vmul.f32 0.5, %v414_v22 }
 0x118   : > { %1393 = vrsqrt.f32 %v2605_v21  ;;  %v804_v30 = vmul.f32 0.5, %v424_v45  ;;  %v811_v33 = vmul.f32 0.5, %v494_v42  ;;  %v812_v37 = vmul.f32 0.5, %v504_v26 }
 0x119   : > { %1395 = vrsqrt.f32 %v2607_v13  ;;  %v519_v25 = vsub.f32 1.5, %v518_v16  ;;  %vm521_vm8 = vweird.f32 %v2448_v61  ;;  %vm522_vm9 = vweird.f32 %v2529_v29 }
 0x11a   : > { %921 = vmatmul.bf16.vlgmr.msra.gmra.mxu0 %v881_v12  ;;  %941 = vmatmul.bf16.vlgmr.msra.gmra.mxu2 %v889_v43  ;;  %vm431_vm10 = vweird.f32 %v2467_v24  ;;  %v509_v60 = vsub.f32 1.5, %v508_v27  ;;  %v429_v20 = vsub.f32 1.5, %v428_v59  ;;  %vm432_vm11 = vweird.f32 %v2537_v2  ;;  %vm2655_vm15 = vmor %vm521_vm8, %vm522_vm9 }
 0x11b   : > { %970 = vmatmul.bf16.vlgmr.msra.gmra.mxu1 %v882_v55  ;;  %990 = vmatmul.bf16.vlgmr.msra.gmra.mxu3 %v890_v44  ;;  %v2628_v48 = vpop.eup %1389  ;;  %v439_v62 = vsub.f32 1.5, %v438_v40  ;;  %v821_v63 = vmul.f32 %v1397_v39, %v803_v31  ;;  %v823_v7 = vmul.f32 %v1398_v18, %v804_v30  ;;  %v837_v10 = vmul.f32 %v1399_v17, %v811_v33  ;;  %vm2668_vm1 = vmor %vm431_vm10, %vm432_vm11  ;;  %v1408_v39 = vld [vmem:[%s1832_s18 + $0xd0] sm:$0xff]  ;;  %v1409_v18 = vld [vmem:[%s1832_s18 + $0x48] sm:$0xff] }
 0x11c   : > { %v839_v54 = vmul.f32 %v1400_v8, %v812_v37  ;;  %v822_v1 = vmul.f32 %v1401_v0, %v803_v31  ;;  %v824_v47 = vmul.f32 %v1402_v5, %v804_v30  ;;  %v838_v53 = vmul.f32 %v1403_v49, %v811_v33  ;;  %v1410_v17 = vld [vmem:[%s1832_s18 + $0x58] sm:$0xff]  ;;  %v1411_v0 = vld [vmem:[%s1832_s18 + $0xc8] sm:$0xff]  ;;  %v1413_v55 = vld [vmem:[%s1832_s18 + $0x60] sm:$0xff] }
 0x11d   : > { %v2631_v28 = vpop.eup %1391  ;;  %v840_v6 = vmul.f32 %v1404_v11, %v812_v37  ;;  %vm511_vm12 = vweird.f32 %v2454_v41  ;;  %vm441_vm13 = vweird.f32 %v2495_v32  ;;  %vm442_vm14 = vweird.f32 %v2541_v52  ;;  %v1412_v5 = vld [vmem:[%s1832_s18 + $0xd8] sm:$0xff] }
 0x11e   : > { %v2637_v19 = vpop.eup %1393  ;;  %v536_v9 = vmul.f32 %v2628_v48, %v2588_v35  ;;  %v520_v57 = vmul.f32 %v2529_v29, %v519_v25  ;;  %v510_v12 = vmul.f32 %v2532_v58, %v509_v60  ;;  %vm512_vm0 = vweird.f32 %v2532_v58  ;;  %vm2673_vm2 = vmor %vm441_vm13, %vm442_vm14  ;;  %v1406_v25 = vld [vmem:[%s1832_s18 + $0x50] sm:$0xff] }
 0x11f   : > { %v2643_v50 = vpop.eup %1395  ;;  %v526_v32 = vmul.f32 %v2631_v28, %v2601_v4  ;;  %v430_v43 = vmul.f32 %v2537_v2, %v429_v20  ;;  %v440_v61 = vmul.f32 %v2541_v52, %v439_v62  ;;  %v883_v56 = vpack.c.bf16 %v823_v7, %v821_v63  ;;  %vm2683_vm3 = vmor %vm511_vm12, %vm512_vm0  ;;  %v1407_v20 = vld [vmem:[%s1832_s18 + $0xc0] sm:$0xff] }
 0x120   : > { %v891_v34 = vpack.c.bf16 %v839_v54, %v837_v10  ;;  %v456_v44 = vmul.f32 %v2637_v19, %v2605_v21  ;;  %v446_v3 = vmul.f32 %v2643_v50, %v2607_v13  ;;  %v884_v51 = vpack.c.bf16 %v824_v47, %v822_v1 }
 0x121   : > { %v892_v24 = vpack.c.bf16 %v840_v6, %v838_v53  ;;  %v537_v15 = vmul.f32 %v2628_v48, %v536_v9  ;;  %v527_v38 = vmul.f32 %v2631_v28, %v526_v32  ;;  %v434_v36 = vsel %vm2668_vm1, %v2537_v2, %v430_v43 }
 0x122   : > { %v444_v41 = vsel %vm2673_vm2, %v2541_v52, %v440_v61  ;;  %v457_v22 = vmul.f32 %v2637_v19, %v456_v44  ;;  %v447_v45 = vmul.f32 %v2643_v50, %v446_v3  ;;  %v514_v42 = vsel %vm2683_vm3, %v2532_v58, %v510_v12  ;;  %v1405_v58 = vld [vmem:[%s1832_s18 + $0x40] sm:$0xff]  ;;  %v1414_v44 = vld [vmem:[%s1832_s18 + $0x70] sm:$0xff] }
 0x123   : > { %v524_v26 = vsel %vm2655_vm15, %v2529_v29, %v520_v57  ;;  %v538_v16 = vmul.f32 0.5, %v537_v15  ;;  %v528_v2 = vmul.f32 0.5, %v527_v38  ;;  %v805_v27 = vmul.f32 0.5, %v434_v36  ;;  %v1418_v38 = vld [vmem:[%s1832_s18 + $0x78] sm:$0xff]  ;;  %v1419_v36 = vld [vmem:[%s1832_s18 + $0xe8] sm:$0xff] }
 0x124   : > { %v806_v59 = vmul.f32 0.5, %v444_v41  ;;  %v813_v52 = vmul.f32 0.5, %v514_v42  ;;  %v814_v40 = vmul.f32 0.5, %v524_v26  ;;  %v458_v31 = vmul.f32 0.5, %v457_v22  ;;  %v1420_v22 = vld [vmem:[%s1832_s18 + $0xf8] sm:$0xff] }
 0x125   : > { %v448_v30 = vmul.f32 0.5, %v447_v45  ;;  %v539_v33 = vsub.f32 1.5, %v538_v16  ;;  %vm541_vm4 = vweird.f32 %v2588_v35  ;;  %vm542_vm5 = vweird.f32 %v2628_v48 }
 0x126   : > { %vm531_vm6 = vweird.f32 %v2601_v4  ;;  %v529_v29 = vsub.f32 1.5, %v528_v2  ;;  %vm532_vm7 = vweird.f32 %v2631_v28  ;;  %v825_v37 = vmul.f32 %v1405_v58, %v805_v27  ;;  %vm2721_vm10 = vmor %vm541_vm4, %vm542_vm5 }
 0x127   : > { %v827_v60 = vmul.f32 %v1406_v25, %v806_v59  ;;  %v841_v62 = vmul.f32 %v1407_v20, %v813_v52  ;;  %v843_v63 = vmul.f32 %v1408_v39, %v814_v40  ;;  %v826_v7 = vmul.f32 %v1409_v18, %v805_v27  ;;  %vm2733_vm13 = vmor %vm531_vm6, %vm532_vm7 }
 0x128   : > { %v828_v10 = vmul.f32 %v1410_v17, %v806_v59  ;;  %v459_v8 = vsub.f32 1.5, %v458_v31  ;;  %v449_v54 = vsub.f32 1.5, %v448_v30  ;;  %v842_v1 = vmul.f32 %v1411_v0, %v813_v52 }
 0x129   : > { %v844_v47 = vmul.f32 %v1412_v5, %v814_v40  ;;  %vm461_vm8 = vweird.f32 %v2605_v21  ;;  %vm462_vm9 = vweird.f32 %v2637_v19  ;;  %vm451_vm11 = vweird.f32 %v2607_v13 }
 0x12a   : > { %926 = vmatmul.bf16.gmra.mxu0 %v883_v56  ;;  %946 = vmatmul.bf16.gmra.mxu2 %v891_v34  ;;  %vm452_vm12 = vweird.f32 %v2643_v50  ;;  %v540_v53 = vmul.f32 %v2628_v48, %v539_v33  ;;  %v530_v11 = vmul.f32 %v2631_v28, %v529_v29  ;;  %v885_v35 = vpack.c.bf16 %v827_v60, %v825_v37  ;;  %vm463_vm14 = vmor %vm461_vm8, %vm462_vm9 }
 0x12b   : > { %975 = vmatmul.bf16.gmra.mxu1 %v884_v51  ;;  %995 = vmatmul.bf16.gmra.mxu3 %v892_v24  ;;  %v893_v6 = vpack.c.bf16 %v843_v63, %v841_v62  ;;  %v460_v9 = vmul.f32 %v2637_v19, %v459_v8  ;;  %v450_v13 = vmul.f32 %v2643_v50, %v449_v54  ;;  %vm453_vm15 = vmor %vm451_vm11, %vm452_vm12  ;;  %v1416_v24 = vld [vmem:[%s1832_s18 + $0xf0] sm:$0xff] }
 0x12c   : > { %v886_v57 = vpack.c.bf16 %v828_v10, %v826_v7  ;;  %v894_v14 = vpack.c.bf16 %v844_v47, %v842_v1  ;;  %v534_v32 = vsel %vm2733_vm13, %v2631_v28, %v530_v11  ;;  %v544_v43 = vsel %vm2721_vm10, %v2628_v48, %v540_v53  ;;  %v1417_v28 = vld [vmem:[%s1832_s18 + $0x68] sm:$0xff] }
 0x12d   : > { %v454_v4 = vsel %vm453_vm15, %v2643_v50, %v450_v13  ;;  %v464_v12 = vsel %vm463_vm14, %v2637_v19, %v460_v9  ;;  %v815_v56 = vmul.f32 0.5, %v534_v32  ;;  %v816_v34 = vmul.f32 0.5, %v544_v43  ;;  %v1415_v19 = vld [vmem:[%s1832_s18 + $0xe0] sm:$0xff]  ;;  %s1042_s18 = sshll.u32 %s2758_s12, 4  ;;  %s1043_s18 = int_to_ptr.vmem [resolvable:$true] %s1042_s18 }
 0x12e   : > { %v807_v46 = vmul.f32 0.5, %v454_v4  ;;  %v808_v61 = vmul.f32 0.5, %v464_v12 }
 0x12f   : > { %v845_v51 = vmul.f32 %v1415_v19, %v815_v56  ;;  %v847_v23 = vmul.f32 %v1416_v24, %v816_v34  ;;  %v846_v41 = vmul.f32 %v1419_v36, %v815_v56  ;;  %v848_v45 = vmul.f32 %v1420_v22, %v816_v34 }
 0x130   : > { %v829_v50 = vmul.f32 %v1413_v55, %v807_v46  ;;  %v831_v3 = vmul.f32 %v1414_v44, %v808_v61  ;;  %v830_v15 = vmul.f32 %v1417_v28, %v807_v46  ;;  %v832_v48 = vmul.f32 %v1418_v38, %v808_v61 }
 0x131   : > { %v895_v26 = vpack.c.bf16 %v847_v23, %v845_v51  ;;  %v896_v2 = vpack.c.bf16 %v848_v45, %v846_v41 }
 0x132   : > { %v887_v42 = vpack.c.bf16 %v831_v3, %v829_v50  ;;  %v888_v16 = vpack.c.bf16 %v832_v48, %v830_v15 }
 0x13a   : > { %931 = vmatmul.bf16.gmra.mxu0 %v885_v35  ;;  %951 = vmatmul.bf16.gmra.mxu2 %v893_v6 }
 0x13b   : > { %980 = vmatmul.bf16.gmra.mxu1 %v886_v57  ;;  %1000 = vmatmul.bf16.gmra.mxu3 %v894_v14 }
 0x14a   : > { %936 = vmatmul.bf16.gmra.mxu0 %v887_v42  ;;  %956 = vmatmul.bf16.gmra.mxu2 %v895_v26 }
 0x14b   : > { %985 = vmatmul.bf16.gmra.mxu1 %v888_v16  ;;  %1005 = vmatmul.bf16.gmra.mxu3 %v896_v2 }
 0x197   : > { %v922_v27 = vpop.f32.mrf.mxu0 }
 0x198   : > { %v971_v59 = vpop.f32.mrf.mxu1 }
 0x199   : > { %v972_v52 = vadd.f32 %v971_v59, %v922_v27 }
 0x19b   : > { %1011 = vst [vmem:[%s2758_s12] sm:$0xff] %v972_v52 }
 0x19d   : > { %v942_v40 = vpop.f32.mrf.mxu2 }
 0x19e   : > { %v991_v31 = vpop.f32.mrf.mxu3 }
 0x19f   : > { %v992_v30 = vadd.f32 %v991_v31, %v942_v40  ;;  %v924_v33 = vpop.f32.mrf.mxu0 }
 0x1a0   : > { %v973_v29 = vpop.f32.mrf.mxu1 }
 0x1a1   : > { %1019 = vst [vmem:[%s2758_s12 + $0x40] sm:$0xff] %v992_v30  ;;  %v974_v58 = vadd.f32 %v973_v29, %v924_v33 }
 0x1a3   : > { %1012 = vst [vmem:[%s2758_s12 + $0x8] sm:$0xff] %v974_v58 }
 0x1a5   : > { %v944_v37 = vpop.f32.mrf.mxu2 }
 0x1a6   : > { %v993_v25 = vpop.f32.mrf.mxu3 }
 0x1a7   : > { %v994_v60 = vadd.f32 %v993_v25, %v944_v37  ;;  %v927_v20 = vpop.f32.mrf.mxu0 }
 0x1a8   : > { %v976_v62 = vpop.f32.mrf.mxu1 }
 0x1a9   : > { %1020 = vst [vmem:[%s2758_s12 + $0x48] sm:$0xff] %v994_v60  ;;  %v977_v39 = vadd.f32 %v976_v62, %v927_v20 }
 0x1ab   : > { %1013 = vst [vmem:[%s2758_s12 + $0x10] sm:$0xff] %v977_v39 }
 0x1ad   : > { %v947_v63 = vpop.f32.mrf.mxu2 }
 0x1ae   : > { %v996_v18 = vpop.f32.mrf.mxu3 }
 0x1af   : > { %v997_v7 = vadd.f32 %v996_v18, %v947_v63  ;;  %v929_v17 = vpop.f32.mrf.mxu0 }
 0x1b0   : > { %v978_v10 = vpop.f32.mrf.mxu1 }
 0x1b1   : > { %1021 = vst [vmem:[%s2758_s12 + $0x50] sm:$0xff] %v997_v7  ;;  %v979_v8 = vadd.f32 %v978_v10, %v929_v17 }
 0x1b3   : > { %1014 = vst [vmem:[%s2758_s12 + $0x18] sm:$0xff] %v979_v8 }
 0x1b5   : > { %v949_v54 = vpop.f32.mrf.mxu2 }
 0x1b6   : > { %v998_v0 = vpop.f32.mrf.mxu3 }
 0x1b7   : > { %v999_v1 = vadd.f32 %v998_v0, %v949_v54  ;;  %v932_v5 = vpop.f32.mrf.mxu0 }
 0x1b8   : > { %v981_v47 = vpop.f32.mrf.mxu1 }
 0x1b9   : > { %1022 = vst [vmem:[%s2758_s12 + $0x58] sm:$0xff] %v999_v1  ;;  %v982_v49 = vadd.f32 %v981_v47, %v932_v5 }
 0x1bb   : > { %1015 = vst [vmem:[%s2758_s12 + $0x20] sm:$0xff] %v982_v49 }
 0x1bd   : > { %v952_v53 = vpop.f32.mrf.mxu2 }
 0x1be   : > { %v1001_v11 = vpop.f32.mrf.mxu3 }
 0x1bf   : > { %v1002_v21 = vadd.f32 %v1001_v11, %v952_v53  ;;  %v934_v35 = vpop.f32.mrf.mxu0 }
 0x1c0   : > { %v983_v6 = vpop.f32.mrf.mxu1 }
 0x1c1   : > { %1023 = vst [vmem:[%s2758_s12 + $0x60] sm:$0xff] %v1002_v21  ;;  %v984_v9 = vadd.f32 %v983_v6, %v934_v35 }
 0x1c3   : > { %1016 = vst [vmem:[%s2758_s12 + $0x28] sm:$0xff] %v984_v9 }
 0x1c5   : > { %v954_v13 = vpop.f32.mrf.mxu2 }
 0x1c6   : > { %v1003_v57 = vpop.f32.mrf.mxu3 }
 0x1c7   : > { %v1004_v14 = vadd.f32 %v1003_v57, %v954_v13  ;;  %v937_v4 = vpop.f32.mrf.mxu0 }
 0x1c8   : > { %v986_v12 = vpop.f32.mrf.mxu1 }
 0x1c9   : > { %1024 = vst [vmem:[%s2758_s12 + $0x68] sm:$0xff] %v1004_v14  ;;  %v987_v32 = vadd.f32 %v986_v12, %v937_v4 }
 0x1cb   : > { %1017 = vst [vmem:[%s2758_s12 + $0x30] sm:$0xff] %v987_v32 }
 0x1cd   : > { %v957_v43 = vpop.f32.mrf.mxu2 }
 0x1ce   : > { %v1006_v46 = vpop.f32.mrf.mxu3 }
 0x1cf   : > { %v1007_v61 = vadd.f32 %v1006_v46, %v957_v43  ;;  %v939_v56 = vpop.f32.mrf.mxu0 }
 0x1d0   : > { %v988_v34 = vpop.f32.mrf.mxu1 }
 0x1d1   : > { %1025 = vst [vmem:[%s2758_s12 + $0x70] sm:$0xff] %v1007_v61  ;;  %v989_v55 = vadd.f32 %v988_v34, %v939_v56 }
 0x1d3   : > { %1018 = vst [vmem:[%s2758_s12 + $0x38] sm:$0xff] %v989_v55 }
 0x1d5   : > { %v959_v50 = vpop.f32.mrf.mxu2 }
 0x1d6   : > { %v1008_v44 = vpop.f32.mrf.mxu3 }
 0x1d7   : > { %v1009_v3 = vadd.f32 %v1008_v44, %v959_v50 }
 0x1d9   : > { %1026 = vst [vmem:[%s2758_s12 + $0x78] sm:$0xff] %v1009_v3 }
 0x1da   : > { %1508 = shalt.err (!%p1505_p10)
}
 0x1db   : > { %s1635_s28 = smov 128   ;;  %s1636_s12 = smov 384  }
 0x1dc   : > { %s1637_s5 = smov 8  }
 0x1dd   : > { %1201 = dma.vmem_to_hbm [thread:$0]  (%p1799_p1), %s1043_s18, 2048, %s1045_s24, %s1028_s15, %s1635_s28, %s1636_s12, %s1637_s5  }
 0x1de PF: > { %p1215_p12 = scmp.ge.s32.totalorder %s1631_s22, 2  ;;  %s1059_s29 = sand.u32 1, %s1579_s9  }
 0x1df   : > { %s1060_s21 = scalar_lea.sflag [#allocation4], %s1059_s29 }
 0x1e0   : > { %p1211_p3 = pnand %p1215_p12, %p1814_p5 }
 0x1e2   : > { %p1212_p13 = pneg %p1211_p3 }
 0x1e4   : > { %1574 = dma.done.wait (%p1212_p13), %s1060_s21, 2048  }
 0x1e5   : > { %1576 = vsyncadd (%p1212_p13), %s1060_s21, 4294965248  ;;  %s21_s22 = sadd.s32 1, %s1631_s22   ;;  %s2960_s19 = sld [smem:[#allocation15_spill]] }
 0x1e6   : > { %p2799_p0 = scmp.ge.s32.totalorder %s21_s22, 8   ;;  %s2961_s27 = sld [smem:[#allocation12_spill]] }
 0x1e7   : > { %s2962_s24 = sld [smem:[#allocation13_spill]]  ;;  %s2964_s9 = smov %s1583_s10 }
 0x1e8   : > { %s2963_s21 = sld [smem:[#allocation14_spill]]  ;;  %s2965_s10 = smov %s1587_s11 }
 0x1e9   : > { %s2966_s11 = smov %s1811_s6  ;;  %s2967_s12 = smov %s1595_s13 }
 0x1ea   : > { %s2968_s13 = smov %s1599_s14  ;;  %s2970_s15 = smov %s1607_s16 }
 0x1eb   : > { %s2969_s14 = smov %s2960_s19  ;;  %s2971_s16 = smov %s1611_s17 }
 0x1ec   : > { %s2972_s17 = smov %s1808_s0  ;;  %s2973_s18 = smov %s1623_s20 }
 0x1ed   : > { %s2974_s19 = smov %s2961_s27  ;;  %s2975_s20 = smov %s2962_s24 }
 0x1ee   :  { %20 = sbr.rel (!%p2799_p0) target bundleno = 15 (0xf), region = 86 }
 0x1f3   :  { %1066 = vsyncpa [#allocation3], 1 }
 0x1f4   :  { %1068 = vsyncpa [#allocation3 + $0x1], 1 }
 0x1f5   :  { %1069 = vsyncpa [#allocation6], 1 }
 0x1f6   :  { %1071 = vsyncpa [#allocation6 + $0x1], 1 }
 0x1f7   :  { %1072 = vsyncpa [#allocation4], 1 }
 0x1f8   :  { %1074 = vsyncpa [#allocation4 + $0x1], 1 }

</bundles_post_ra>
